<compile_context>
chip_gen: v7x
topology: tpu7x:2x2x1
jax: 0.10.0
libtpu: 0.0.40
codegen_flags: <defaults>
</compile_context>

<pallas_src>
import jax
import jax.numpy as jnp
from jax.experimental import pallas as pl
from jax.experimental.pallas import tpu as pltpu

_EPS = 1e-4  # pytorch3d se3_exp_map eps (clamps the squared rotation-log norm)


def _round_up(x, m):
    return ((x + m - 1) // m) * m


def _pick_tiles(M, N, vmem_budget_bytes=20 * 1024 * 1024):
    """Pick (tile_m, tile_n) for the point-transform stream kernel.

    tile_n stays lane-dense (full N, or a 128-multiple divisor of N when N is huge);
    tile_m is the largest multiple of 8 whose double-buffered working set fits a
    conservative VMEM budget (sized so it is safe on v7x's 64 MiB VMEM as well)."""
    lane = 128
    if N % lane == 0 and N > 2048:
        tile_n = 2048
        while N % tile_n:
            tile_n -= lane
    else:
        tile_n = N
    m_cap = min(512, _round_up(M, 8))
    tile_m = 8
    tm = m_cap
    while tm >= 8:
        # double-buffered: xv tile + asm tile (+ tiny pred tile), f32
        step_bytes = 2 * (2 * 3 * tm * tile_n + tm * 16) * 4
        if step_bytes <= vmem_budget_bytes:
            tile_m = tm
            break
        tm -= 8
    return tile_m, tile_n


def _se3_components(d):
    """se3_exp_map on an (m, 6) block -> rotation R[i][j] and translation T[i]
    as lists of (m, 1) arrays, pytorch3d row-vector convention."""
    vx, vy, vz = d[:, 0:1], d[:, 1:2], d[:, 2:3]          # translation log
    wx, wy, wz = d[:, 3:4], d[:, 4:5], d[:, 5:6]          # rotation log
    nrm = wx * wx + wy * wy + wz * wz
    theta = jnp.sqrt(jnp.maximum(nrm, _EPS))
    sin_t = jnp.sin(theta)
    cos_t = jnp.cos(theta)
    fac1 = sin_t / theta                                   # sin(th)/th
    fac2 = (1.0 - cos_t) / (theta * theta)                 # (1-cos(th))/th^2
    fac3 = (theta - sin_t) / (theta * theta * theta)       # (th-sin(th))/th^3

    zero = jnp.zeros_like(wx)
    K = [[zero, -wz, wy],
         [wz, zero, -wx],
         [-wy, wx, zero]]
    w = [wx, wy, wz]
    v = [vx, vy, vz]

    R = [[None] * 3 for _ in range(3)]
    V = [[None] * 3 for _ in range(3)]
    for i in range(3):
        for j in range(3):
            ksq = w[i] * w[j] - (nrm if i == j else zero)  # (K @ K)[i, j]
            eye = 1.0 if i == j else 0.0
            R[i][j] = eye + fac1 * K[i][j] + fac2 * ksq
            V[i][j] = eye + fac2 * K[i][j] + fac3 * ksq
    T = [V[i][0] * v[0] + V[i][1] * v[1] + V[i][2] * v[2] for i in range(3)]
    return R, T


def _se3_pred2gt_kernel(dofs_ref, gtdof_ref, pred_ref, p2g_ref):
    """Prologue over (tile_m, 6) dof rows:
       pred_ref : flattened row-major 4x4 of se3_exp_map(dofs)     (tile_m, 16)
       p2g_ref  : flattened row-major 4x4 of gt^-1 @ pred          (tile_m, 16)"""
    Rp, Tp = _se3_components(dofs_ref[...])
    Rg, Tg = _se3_components(gtdof_ref[...])
    zero = jnp.zeros_like(Tp[0])
    one = jnp.ones_like(Tp[0])

    # predicted matrix, row-major: rows 0..2 = [R_row, 0], row 3 = [T, 1]
    pred_cols = []
    for i in range(3):
        pred_cols += [Rp[i][0], Rp[i][1], Rp[i][2], zero]
    pred_cols += [Tp[0], Tp[1], Tp[2], one]
    pred_ref[...] = jnp.concatenate(pred_cols, axis=-1)    # single lane-dense store

    # pred2gt = gt^-1 @ pred, with closed-form rigid inverse
    #   gt^-1 = [[Rg^T, 0], [-Tg @ Rg^T, 1]]   (exact for SE(3) exp-map outputs)
    C = [[Rg[0][i] * Rp[0][j] + Rg[1][i] * Rp[1][j] + Rg[2][i] * Rp[2][j]
          for j in range(3)] for i in range(3)]
    a = [-(Tg[0] * Rg[i][0] + Tg[1] * Rg[i][1] + Tg[2] * Rg[i][2]) for i in range(3)]
    t = [a[0] * Rp[0][j] + a[1] * Rp[1][j] + a[2] * Rp[2][j] + Tp[j] for j in range(3)]

    p2g_cols = []
    for i in range(3):
        p2g_cols += [C[i][0], C[i][1], C[i][2], zero]
    p2g_cols += [t[0], t[1], t[2], one]
    p2g_ref[...] = jnp.concatenate(p2g_cols, axis=-1)      # single lane-dense store


def _transform_points_kernel(pred_ref, xv_ref, asm_ref):
    """Point stream: xv/asm blocks are (3, tile_m, tile_n) with points on lanes.
       out[:, j] = p0 * R[0][j] + p1 * R[1][j] + p2 * R[2][j] + T[j]."""
    pm = pred_ref[...]                        # (tile_m, 16) row-major pred matrix
    p0 = xv_ref[0]                            # (tile_m, tile_n)
    p1 = xv_ref[1]
    p2 = xv_ref[2]
    for j in range(3):
        r0 = pm[:, 0 + j:1 + j]               # R[0][j]  (tile_m, 1) -> lane broadcast
        r1 = pm[:, 4 + j:5 + j]               # R[1][j]
        r2 = pm[:, 8 + j:9 + j]               # R[2][j]
        tj = pm[:, 12 + j:13 + j]             # T[j]
        asm_ref[j] = p0 * r0 + p1 * r1 + p2 * r2 + tj


def tooth_assembler(X_v, dofs, gt_dofs):
    """X_v: (B, T, N, 3), dofs: (B, T, 6), gt_dofs (= X['6dof']): (B, T, 6).
    Returns (assembled (B, T, N, 3), pred2gt (B, T, 4, 4))."""
    B, T, N, _ = X_v.shape
    M = B * T
    tile_m, tile_n = _pick_tiles(M, N)
    M_pad = _round_up(M, tile_m)

    def pad_rows(x):
        pad = M_pad - x.shape[0]
        if pad:
            x = jnp.pad(x, ((0, pad),) + ((0, 0),) * (x.ndim - 1))
        return x

    dofs_k = pad_rows(dofs.reshape(M, 6).astype(jnp.float32))
    gt_k = pad_rows(gt_dofs.reshape(M, 6).astype(jnp.float32))

    # -------- prologue: SE(3) exp-map + pred2gt over (M, 6) rows --------
    pred_mat, p2g_flat = pl.pallas_call(
        _se3_pred2gt_kernel,
        out_shape=(
            jax.ShapeDtypeStruct((M_pad, 16), jnp.float32),
            jax.ShapeDtypeStruct((M_pad, 16), jnp.float32),
        ),
        grid=(M_pad // tile_m,),
        in_specs=[
            pl.BlockSpec((tile_m, 6), lambda i: (i, 0)),
            pl.BlockSpec((tile_m, 6), lambda i: (i, 0)),
        ],
        out_specs=(
            pl.BlockSpec((tile_m, 16), lambda i: (i, 0)),
            pl.BlockSpec((tile_m, 16), lambda i: (i, 0)),
        ),
        compiler_params=pltpu.CompilerParams(dimension_semantics=("parallel",)),
    )(dofs_k, gt_k)

    # -------- point stream: coordinate axis leading -> (3, M_pad, N) --------
    # TODO(synk): if upstream/downstream can adopt the (3, M, N) layout, these two
    # moveaxis transposes (extra HBM passes) can be dropped entirely.
    xv_k = jnp.moveaxis(X_v.reshape(M, N, 3).astype(jnp.float32), -1, 0)  # (3, M, N)
    if M_pad != M:
        xv_k = jnp.pad(xv_k, ((0, 0), (0, M_pad - M), (0, 0)))

    grid = (M_pad // tile_m, N // tile_n)
    asm_t = pl.pallas_call(
        _transform_points_kernel,
        out_shape=jax.ShapeDtypeStruct((3, M_pad, N), jnp.float32),
        grid=grid,
        in_specs=[
            pl.BlockSpec((tile_m, 16), lambda i, j: (i, 0)),
            pl.BlockSpec((3, tile_m, tile_n), lambda i, j: (0, i, j)),
        ],
        out_specs=pl.BlockSpec((3, tile_m, tile_n), lambda i, j: (0, i, j)),
        compiler_params=pltpu.CompilerParams(
            dimension_semantics=("parallel", "parallel"),
            vmem_limit_bytes=32 * 1024 * 1024,
        ),
    )(pred_mat, xv_k)

    assembled = jnp.moveaxis(asm_t[:, :M, :], 0, -1).reshape(B, T, N, 3)
    pred2gt = p2g_flat[:M].reshape(B, T, 4, 4)
    return assembled, pred2gt


# ---------------- pure-JAX reference (for correctness check only) ----------------
def _se3_exp_map_ref(d):
    v, w = d[:, :3], d[:, 3:]
    nrm = jnp.sum(w * w, axis=-1)
    theta = jnp.sqrt(jnp.maximum(nrm, _EPS))
    fac1 = jnp.sin(theta) / theta
    fac2 = (1.0 - jnp.cos(theta)) / theta ** 2
    fac3 = (theta - jnp.sin(theta)) / theta ** 3
    z = jnp.zeros_like(w[:, 0])
    K = jnp.stack([
        jnp.stack([z, -w[:, 2], w[:, 1]], -1),
        jnp.stack([w[:, 2], z, -w[:, 0]], -1),
        jnp.stack([-w[:, 1], w[:, 0], z], -1)], -2)
    K2 = jnp.matmul(K, K)
    I3 = jnp.eye(3, dtype=d.dtype)
    R = I3 + fac1[:, None, None] * K + fac2[:, None, None] * K2
    V = I3 + fac2[:, None, None] * K + fac3[:, None, None] * K2
    t = jnp.einsum('mij,mj->mi', V, v)
    m = jnp.zeros((d.shape[0], 4, 4), d.dtype)
    return m.at[:, :3, :3].set(R).at[:, 3, :3].set(t).at[:, 3, 3].set(1.0)


def _reference(X_v, dofs, gt_dofs):
    B, T, N, _ = X_v.shape
    M = B * T
    pred = _se3_exp_map_ref(dofs.reshape(M, 6).astype(jnp.float32))
    gt = _se3_exp_map_ref(gt_dofs.reshape(M, 6).astype(jnp.float32))
    pts = X_v.reshape(M, N, 3).astype(jnp.float32)
    asm = jnp.einsum('mni,mij->mnj', pts, pred[:, :3, :3]) + pred[:, None, 3, :3]
    p2g = jnp.matmul(jnp.linalg.inv(gt), pred)
    return asm.reshape(B, T, N, 3), p2g.reshape(B, T, 4, 4)


if __name__ == "__main__":
    key = jax.random.PRNGKey(0)
    B, T, N = 2, 4, 128                      # batch, teeth, points per tooth
    k1, k2, k3 = jax.random.split(key, 3)
    X_v = jax.random.normal(k1, (B, T, N, 3), dtype=jnp.float32)
    dofs = 0.3 * jax.random.normal(k2, (B, T, 6), dtype=jnp.float32)       # predicted 6-dof
    gt_6dof = 0.3 * jax.random.normal(k3, (B, T, 6), dtype=jnp.float32)    # X['6dof']

    run = jax.jit(tooth_assembler)
    assembled, pred2gt = run(X_v, dofs, gt_6dof)
    jax.block_until_ready((assembled, pred2gt))

    asm_ref, p2g_ref = _reference(X_v, dofs, gt_6dof)
    assert assembled.shape == (B, T, N, 3) and pred2gt.shape == (B, T, 4, 4)
    assert float(jnp.max(jnp.abs(assembled - asm_ref))) < 1e-3
    assert float(jnp.max(jnp.abs(pred2gt - p2g_ref))) < 1e-3

    print("KERNEL_OK")
</pallas_src>

<mosaic_0001>
module attributes {stable_mosaic.version = 11 : i64} {
  func.func @_transform_points_kernel(%arg0: i32, %arg1: i32, %arg2: memref<8x16xf32, #tpu.memory_space<vmem>>, %arg3: memref<3x8x128xf32, #tpu.memory_space<vmem>>, %arg4: memref<3x8x128xf32, #tpu.memory_space<vmem>>) attributes {dimension_semantics = [#tpu.dimension_semantics<parallel>, #tpu.dimension_semantics<parallel>], iteration_bounds = array<i64: 1, 1>, scalar_prefetch = 0 : i64, scratch_operands = 0 : i64, tpu.core_type = #tpu.core_type<tc>, window_params = [{transform_indices = @transform_0, window_bounds = array<i64: 8, 16>}, {transform_indices = @transform_1, window_bounds = array<i64: 3, 8, 128>}, {transform_indices = @transform_2, window_bounds = array<i64: 3, 8, 128>}]} {
    %c0 = arith.constant 0 : index
    %c0_0 = arith.constant 0 : index
    %0 = vector.load %arg2[%c0, %c0_0] : memref<8x16xf32, #tpu.memory_space<vmem>>, vector<8x16xf32>
    %c0_1 = arith.constant 0 : index
    %c0_2 = arith.constant 0 : index
    %c0_3 = arith.constant 0 : index
    %1 = vector.load %arg3[%c0_1, %c0_2, %c0_3] : memref<3x8x128xf32, #tpu.memory_space<vmem>>, vector<1x8x128xf32>
    %2 = vector.shape_cast %1 : vector<1x8x128xf32> to vector<8x128xf32>
    %c1 = arith.constant 1 : index
    %c0_4 = arith.constant 0 : index
    %c0_5 = arith.constant 0 : index
    %3 = vector.load %arg3[%c1, %c0_4, %c0_5] : memref<3x8x128xf32, #tpu.memory_space<vmem>>, vector<1x8x128xf32>
    %4 = vector.shape_cast %3 : vector<1x8x128xf32> to vector<8x128xf32>
    %c2 = arith.constant 2 : index
    %c0_6 = arith.constant 0 : index
    %c0_7 = arith.constant 0 : index
    %5 = vector.load %arg3[%c2, %c0_6, %c0_7] : memref<3x8x128xf32, #tpu.memory_space<vmem>>, vector<1x8x128xf32>
    %6 = vector.shape_cast %5 : vector<1x8x128xf32> to vector<8x128xf32>
    %7 = vector.extract_strided_slice %0 {offsets = [0, 0], sizes = [8, 1], strides = [1, 1]} : vector<8x16xf32> to vector<8x1xf32>
    %8 = vector.extract_strided_slice %0 {offsets = [0, 4], sizes = [8, 1], strides = [1, 1]} : vector<8x16xf32> to vector<8x1xf32>
    %9 = vector.extract_strided_slice %0 {offsets = [0, 8], sizes = [8, 1], strides = [1, 1]} : vector<8x16xf32> to vector<8x1xf32>
    %10 = vector.extract_strided_slice %0 {offsets = [0, 12], sizes = [8, 1], strides = [1, 1]} : vector<8x16xf32> to vector<8x1xf32>
    %11 = vector.broadcast %7 : vector<8x1xf32> to vector<8x128xf32>
    %12 = arith.mulf %2, %11 : vector<8x128xf32>
    %13 = vector.broadcast %8 : vector<8x1xf32> to vector<8x128xf32>
    %14 = arith.mulf %4, %13 : vector<8x128xf32>
    %15 = arith.addf %12, %14 : vector<8x128xf32>
    %16 = vector.broadcast %9 : vector<8x1xf32> to vector<8x128xf32>
    %17 = arith.mulf %6, %16 : vector<8x128xf32>
    %18 = arith.addf %15, %17 : vector<8x128xf32>
    %19 = vector.broadcast %10 : vector<8x1xf32> to vector<8x128xf32>
    %20 = arith.addf %18, %19 : vector<8x128xf32>
    %c0_8 = arith.constant 0 : index
    %c0_9 = arith.constant 0 : index
    %c0_10 = arith.constant 0 : index
    %21 = vector.load %arg4[%c0_8, %c0_9, %c0_10] : memref<3x8x128xf32, #tpu.memory_space<vmem>>, vector<1x8x128xf32>
    %22 = vector.shape_cast %21 : vector<1x8x128xf32> to vector<8x128xf32>
    %23 = vector.shape_cast %20 : vector<8x128xf32> to vector<1x8x128xf32>
    tpu.vector_store %arg4[%c0_8, %c0_9, %c0_10], %23 {strides = array<i32>} : memref<3x8x128xf32, #tpu.memory_space<vmem>>, vector<1x8x128xf32>,
    %24 = vector.extract_strided_slice %0 {offsets = [0, 1], sizes = [8, 1], strides = [1, 1]} : vector<8x16xf32> to vector<8x1xf32>
    %25 = vector.extract_strided_slice %0 {offsets = [0, 5], sizes = [8, 1], strides = [1, 1]} : vector<8x16xf32> to vector<8x1xf32>
    %26 = vector.extract_strided_slice %0 {offsets = [0, 9], sizes = [8, 1], strides = [1, 1]} : vector<8x16xf32> to vector<8x1xf32>
    %27 = vector.extract_strided_slice %0 {offsets = [0, 13], sizes = [8, 1], strides = [1, 1]} : vector<8x16xf32> to vector<8x1xf32>
    %28 = vector.broadcast %24 : vector<8x1xf32> to vector<8x128xf32>
    %29 = arith.mulf %2, %28 : vector<8x128xf32>
    %30 = vector.broadcast %25 : vector<8x1xf32> to vector<8x128xf32>
    %31 = arith.mulf %4, %30 : vector<8x128xf32>
    %32 = arith.addf %29, %31 : vector<8x128xf32>
    %33 = vector.broadcast %26 : vector<8x1xf32> to vector<8x128xf32>
    %34 = arith.mulf %6, %33 : vector<8x128xf32>
    %35 = arith.addf %32, %34 : vector<8x128xf32>
    %36 = vector.broadcast %27 : vector<8x1xf32> to vector<8x128xf32>
    %37 = arith.addf %35, %36 : vector<8x128xf32>
    %c1_11 = arith.constant 1 : index
    %c0_12 = arith.constant 0 : index
    %c0_13 = arith.constant 0 : index
    %38 = vector.load %arg4[%c1_11, %c0_12, %c0_13] : memref<3x8x128xf32, #tpu.memory_space<vmem>>, vector<1x8x128xf32>
    %39 = vector.shape_cast %38 : vector<1x8x128xf32> to vector<8x128xf32>
    %40 = vector.shape_cast %37 : vector<8x128xf32> to vector<1x8x128xf32>
    tpu.vector_store %arg4[%c1_11, %c0_12, %c0_13], %40 {strides = array<i32>} : memref<3x8x128xf32, #tpu.memory_space<vmem>>, vector<1x8x128xf32>,
    %41 = vector.extract_strided_slice %0 {offsets = [0, 2], sizes = [8, 1], strides = [1, 1]} : vector<8x16xf32> to vector<8x1xf32>
    %42 = vector.extract_strided_slice %0 {offsets = [0, 6], sizes = [8, 1], strides = [1, 1]} : vector<8x16xf32> to vector<8x1xf32>
    %43 = vector.extract_strided_slice %0 {offsets = [0, 10], sizes = [8, 1], strides = [1, 1]} : vector<8x16xf32> to vector<8x1xf32>
    %44 = vector.extract_strided_slice %0 {offsets = [0, 14], sizes = [8, 1], strides = [1, 1]} : vector<8x16xf32> to vector<8x1xf32>
    %45 = vector.broadcast %41 : vector<8x1xf32> to vector<8x128xf32>
    %46 = arith.mulf %2, %45 : vector<8x128xf32>
    %47 = vector.broadcast %42 : vector<8x1xf32> to vector<8x128xf32>
    %48 = arith.mulf %4, %47 : vector<8x128xf32>
    %49 = arith.addf %46, %48 : vector<8x128xf32>
    %50 = vector.broadcast %43 : vector<8x1xf32> to vector<8x128xf32>
    %51 = arith.mulf %6, %50 : vector<8x128xf32>
    %52 = arith.addf %49, %51 : vector<8x128xf32>
    %53 = vector.broadcast %44 : vector<8x1xf32> to vector<8x128xf32>
    %54 = arith.addf %52, %53 : vector<8x128xf32>
    %c2_14 = arith.constant 2 : index
    %c0_15 = arith.constant 0 : index
    %c0_16 = arith.constant 0 : index
    %55 = vector.load %arg4[%c2_14, %c0_15, %c0_16] : memref<3x8x128xf32, #tpu.memory_space<vmem>>, vector<1x8x128xf32>
    %56 = vector.shape_cast %55 : vector<1x8x128xf32> to vector<8x128xf32>
    %57 = vector.shape_cast %54 : vector<8x128xf32> to vector<1x8x128xf32>
    tpu.vector_store %arg4[%c2_14, %c0_15, %c0_16], %57 {strides = array<i32>} : memref<3x8x128xf32, #tpu.memory_space<vmem>>, vector<1x8x128xf32>,
    return
  }
  func.func @transform_0(%arg0: i32, %arg1: i32) -> (i32, i32) {
    %c0_i32 = arith.constant 0 : i32
    %c0_i32_0 = arith.constant 0 : i32
    return %arg0, %c0_i32 : i32, i32
  }
  func.func @transform_1(%arg0: i32, %arg1: i32) -> (i32, i32, i32) {
    %c0_i32 = arith.constant 0 : i32
    %c0_i32_0 = arith.constant 0 : i32
    return %c0_i32, %arg0, %arg1 : i32, i32, i32
  }
  func.func @transform_2(%arg0: i32, %arg1: i32) -> (i32, i32, i32) {
    %c0_i32 = arith.constant 0 : i32
    %c0_i32_0 = arith.constant 0 : i32
    return %c0_i32, %arg0, %arg1 : i32, i32, i32
  }
}

module attributes {stable_mosaic.version = 11 : i64} {
  func.func @_se3_pred2gt_kernel(%arg0: i32, %arg1: memref<8x6xf32, #tpu.memory_space<vmem>>, %arg2: memref<8x6xf32, #tpu.memory_space<vmem>>, %arg3: memref<8x16xf32, #tpu.memory_space<vmem>>, %arg4: memref<8x16xf32, #tpu.memory_space<vmem>>) attributes {dimension_semantics = [#tpu.dimension_semantics<parallel>], iteration_bounds = array<i64: 1>, scalar_prefetch = 0 : i64, scratch_operands = 0 : i64, tpu.core_type = #tpu.core_type<tc>, window_params = [{transform_indices = @transform_0, window_bounds = array<i64: 8, 6>}, {transform_indices = @transform_1, window_bounds = array<i64: 8, 6>}, {transform_indices = @transform_2, window_bounds = array<i64: 8, 16>}, {transform_indices = @transform_3, window_bounds = array<i64: 8, 16>}]} {
    %c0 = arith.constant 0 : index
    %c0_0 = arith.constant 0 : index
    %0 = vector.load %arg1[%c0, %c0_0] : memref<8x6xf32, #tpu.memory_space<vmem>>, vector<8x6xf32>
    %1 = vector.extract_strided_slice %0 {offsets = [0, 0], sizes = [8, 1], strides = [1, 1]} : vector<8x6xf32> to vector<8x1xf32>
    %2 = vector.extract_strided_slice %0 {offsets = [0, 1], sizes = [8, 1], strides = [1, 1]} : vector<8x6xf32> to vector<8x1xf32>
    %3 = vector.extract_strided_slice %0 {offsets = [0, 2], sizes = [8, 1], strides = [1, 1]} : vector<8x6xf32> to vector<8x1xf32>
    %4 = vector.extract_strided_slice %0 {offsets = [0, 3], sizes = [8, 1], strides = [1, 1]} : vector<8x6xf32> to vector<8x1xf32>
    %5 = vector.extract_strided_slice %0 {offsets = [0, 4], sizes = [8, 1], strides = [1, 1]} : vector<8x6xf32> to vector<8x1xf32>
    %6 = vector.extract_strided_slice %0 {offsets = [0, 5], sizes = [8, 1], strides = [1, 1]} : vector<8x6xf32> to vector<8x1xf32>
    %7 = arith.mulf %4, %4 : vector<8x1xf32>
    %8 = arith.mulf %5, %5 : vector<8x1xf32>
    %9 = arith.addf %7, %8 : vector<8x1xf32>
    %10 = arith.mulf %6, %6 : vector<8x1xf32>
    %11 = arith.addf %9, %10 : vector<8x1xf32>
    %cst = arith.constant 9.99999974E-5 : f32
    %12 = vector.broadcast %cst : f32 to vector<8x1xf32>
    %13 = arith.maximumf %11, %12 : vector<8x1xf32>
    %14 = math.sqrt %13 : vector<8x1xf32>
    %15 = math.sin %14 : vector<8x1xf32>
    %16 = math.cos %14 : vector<8x1xf32>
    %17 = arith.divf %15, %14 : vector<8x1xf32>
    %cst_1 = arith.constant 1.000000e+00 : f32
    %18 = vector.broadcast %cst_1 : f32 to vector<8x1xf32>
    %19 = arith.subf %18, %16 : vector<8x1xf32>
    %20 = arith.mulf %14, %14 : vector<8x1xf32>
    %21 = arith.divf %19, %20 : vector<8x1xf32>
    %22 = arith.subf %14, %15 : vector<8x1xf32>
    %23 = arith.mulf %14, %14 : vector<8x1xf32>
    %24 = arith.mulf %23, %14 : vector<8x1xf32>
    %25 = arith.divf %22, %24 : vector<8x1xf32>
    %cst_2 = arith.constant 0.000000e+00 : f32
    %26 = vector.broadcast %cst_2 : f32 to vector<8x1xf32>
    %cst_3 = arith.constant 0.000000e+00 : f32
    %27 = vector.broadcast %cst_3 : f32 to vector<8x1xf32>
    %28 = arith.subf %27, %6 : vector<8x1xf32>
    %cst_4 = arith.constant 0.000000e+00 : f32
    %29 = vector.broadcast %cst_4 : f32 to vector<8x1xf32>
    %30 = arith.subf %29, %4 : vector<8x1xf32>
    %cst_5 = arith.constant 0.000000e+00 : f32
    %31 = vector.broadcast %cst_5 : f32 to vector<8x1xf32>
    %32 = arith.subf %31, %5 : vector<8x1xf32>
    %33 = arith.mulf %4, %4 : vector<8x1xf32>
    %34 = arith.subf %33, %11 : vector<8x1xf32>
    %35 = arith.mulf %17, %26 : vector<8x1xf32>
    %cst_6 = arith.constant 1.000000e+00 : f32
    %36 = vector.broadcast %cst_6 : f32 to vector<8x1xf32>
    %37 = arith.addf %36, %35 : vector<8x1xf32>
    %38 = arith.mulf %21, %34 : vector<8x1xf32>
    %39 = arith.addf %37, %38 : vector<8x1xf32>
    %40 = arith.mulf %21, %26 : vector<8x1xf32>
    %cst_7 = arith.constant 1.000000e+00 : f32
    %41 = vector.broadcast %cst_7 : f32 to vector<8x1xf32>
    %42 = arith.addf %41, %40 : vector<8x1xf32>
    %43 = arith.mulf %25, %34 : vector<8x1xf32>
    %44 = arith.addf %42, %43 : vector<8x1xf32>
    %45 = arith.mulf %4, %5 : vector<8x1xf32>
    %46 = arith.subf %45, %26 : vector<8x1xf32>
    %47 = arith.mulf %17, %28 : vector<8x1xf32>
    %cst_8 = arith.constant 0.000000e+00 : f32
    %48 = vector.broadcast %cst_8 : f32 to vector<8x1xf32>
    %49 = arith.addf %48, %47 : vector<8x1xf32>
    %50 = arith.mulf %21, %46 : vector<8x1xf32>
    %51 = arith.addf %49, %50 : vector<8x1xf32>
    %52 = arith.mulf %21, %28 : vector<8x1xf32>
    %cst_9 = arith.constant 0.000000e+00 : f32
    %53 = vector.broadcast %cst_9 : f32 to vector<8x1xf32>
    %54 = arith.addf %53, %52 : vector<8x1xf32>
    %55 = arith.mulf %25, %46 : vector<8x1xf32>
    %56 = arith.addf %54, %55 : vector<8x1xf32>
    %57 = arith.mulf %4, %6 : vector<8x1xf32>
    %58 = arith.subf %57, %26 : vector<8x1xf32>
    %59 = arith.mulf %17, %5 : vector<8x1xf32>
    %cst_10 = arith.constant 0.000000e+00 : f32
    %60 = vector.broadcast %cst_10 : f32 to vector<8x1xf32>
    %61 = arith.addf %60, %59 : vector<8x1xf32>
    %62 = arith.mulf %21, %58 : vector<8x1xf32>
    %63 = arith.addf %61, %62 : vector<8x1xf32>
    %64 = arith.mulf %21, %5 : vector<8x1xf32>
    %cst_11 = arith.constant 0.000000e+00 : f32
    %65 = vector.broadcast %cst_11 : f32 to vector<8x1xf32>
    %66 = arith.addf %65, %64 : vector<8x1xf32>
    %67 = arith.mulf %25, %58 : vector<8x1xf32>
    %68 = arith.addf %66, %67 : vector<8x1xf32>
    %69 = arith.mulf %5, %4 : vector<8x1xf32>
    %70 = arith.subf %69, %26 : vector<8x1xf32>
    %71 = arith.mulf %17, %6 : vector<8x1xf32>
    %cst_12 = arith.constant 0.000000e+00 : f32
    %72 = vector.broadcast %cst_12 : f32 to vector<8x1xf32>
    %73 = arith.addf %72, %71 : vector<8x1xf32>
    %74 = arith.mulf %21, %70 : vector<8x1xf32>
    %75 = arith.addf %73, %74 : vector<8x1xf32>
    %76 = arith.mulf %21, %6 : vector<8x1xf32>
    %cst_13 = arith.constant 0.000000e+00 : f32
    %77 = vector.broadcast %cst_13 : f32 to vector<8x1xf32>
    %78 = arith.addf %77, %76 : vector<8x1xf32>
    %79 = arith.mulf %25, %70 : vector<8x1xf32>
    %80 = arith.addf %78, %79 : vector<8x1xf32>
    %81 = arith.mulf %5, %5 : vector<8x1xf32>
    %82 = arith.subf %81, %11 : vector<8x1xf32>
    %83 = arith.mulf %17, %26 : vector<8x1xf32>
    %cst_14 = arith.constant 1.000000e+00 : f32
    %84 = vector.broadcast %cst_14 : f32 to vector<8x1xf32>
    %85 = arith.addf %84, %83 : vector<8x1xf32>
    %86 = arith.mulf %21, %82 : vector<8x1xf32>
    %87 = arith.addf %85, %86 : vector<8x1xf32>
    %88 = arith.mulf %21, %26 : vector<8x1xf32>
    %cst_15 = arith.constant 1.000000e+00 : f32
    %89 = vector.broadcast %cst_15 : f32 to vector<8x1xf32>
    %90 = arith.addf %89, %88 : vector<8x1xf32>
    %91 = arith.mulf %25, %82 : vector<8x1xf32>
    %92 = arith.addf %90, %91 : vector<8x1xf32>
    %93 = arith.mulf %5, %6 : vector<8x1xf32>
    %94 = arith.subf %93, %26 : vector<8x1xf32>
    %95 = arith.mulf %17, %30 : vector<8x1xf32>
    %cst_16 = arith.constant 0.000000e+00 : f32
    %96 = vector.broadcast %cst_16 : f32 to vector<8x1xf32>
    %97 = arith.addf %96, %95 : vector<8x1xf32>
    %98 = arith.mulf %21, %94 : vector<8x1xf32>
    %99 = arith.addf %97, %98 : vector<8x1xf32>
    %100 = arith.mulf %21, %30 : vector<8x1xf32>
    %cst_17 = arith.constant 0.000000e+00 : f32
    %101 = vector.broadcast %cst_17 : f32 to vector<8x1xf32>
    %102 = arith.addf %101, %100 : vector<8x1xf32>
    %103 = arith.mulf %25, %94 : vector<8x1xf32>
    %104 = arith.addf %102, %103 : vector<8x1xf32>
    %105 = arith.mulf %6, %4 : vector<8x1xf32>
    %106 = arith.subf %105, %26 : vector<8x1xf32>
    %107 = arith.mulf %17, %32 : vector<8x1xf32>
    %cst_18 = arith.constant 0.000000e+00 : f32
    %108 = vector.broadcast %cst_18 : f32 to vector<8x1xf32>
    %109 = arith.addf %108, %107 : vector<8x1xf32>
    %110 = arith.mulf %21, %106 : vector<8x1xf32>
    %111 = arith.addf %109, %110 : vector<8x1xf32>
    %112 = arith.mulf %21, %32 : vector<8x1xf32>
    %cst_19 = arith.constant 0.000000e+00 : f32
    %113 = vector.broadcast %cst_19 : f32 to vector<8x1xf32>
    %114 = arith.addf %113, %112 : vector<8x1xf32>
    %115 = arith.mulf %25, %106 : vector<8x1xf32>
    %116 = arith.addf %114, %115 : vector<8x1xf32>
    %117 = arith.mulf %6, %5 : vector<8x1xf32>
    %118 = arith.subf %117, %26 : vector<8x1xf32>
    %119 = arith.mulf %17, %4 : vector<8x1xf32>
    %cst_20 = arith.constant 0.000000e+00 : f32
    %120 = vector.broadcast %cst_20 : f32 to vector<8x1xf32>
    %121 = arith.addf %120, %119 : vector<8x1xf32>
    %122 = arith.mulf %21, %118 : vector<8x1xf32>
    %123 = arith.addf %121, %122 : vector<8x1xf32>
    %124 = arith.mulf %21, %4 : vector<8x1xf32>
    %cst_21 = arith.constant 0.000000e+00 : f32
    %125 = vector.broadcast %cst_21 : f32 to vector<8x1xf32>
    %126 = arith.addf %125, %124 : vector<8x1xf32>
    %127 = arith.mulf %25, %118 : vector<8x1xf32>
    %128 = arith.addf %126, %127 : vector<8x1xf32>
    %129 = arith.mulf %6, %6 : vector<8x1xf32>
    %130 = arith.subf %129, %11 : vector<8x1xf32>
    %131 = arith.mulf %17, %26 : vector<8x1xf32>
    %cst_22 = arith.constant 1.000000e+00 : f32
    %132 = vector.broadcast %cst_22 : f32 to vector<8x1xf32>
    %133 = arith.addf %132, %131 : vector<8x1xf32>
    %134 = arith.mulf %21, %130 : vector<8x1xf32>
    %135 = arith.addf %133, %134 : vector<8x1xf32>
    %136 = arith.mulf %21, %26 : vector<8x1xf32>
    %cst_23 = arith.constant 1.000000e+00 : f32
    %137 = vector.broadcast %cst_23 : f32 to vector<8x1xf32>
    %138 = arith.addf %137, %136 : vector<8x1xf32>
    %139 = arith.mulf %25, %130 : vector<8x1xf32>
    %140 = arith.addf %138, %139 : vector<8x1xf32>
    %141 = arith.mulf %44, %1 : vector<8x1xf32>
    %142 = arith.mulf %56, %2 : vector<8x1xf32>
    %143 = arith.addf %141, %142 : vector<8x1xf32>
    %144 = arith.mulf %68, %3 : vector<8x1xf32>
    %145 = arith.addf %143, %144 : vector<8x1xf32>
    %146 = arith.mulf %80, %1 : vector<8x1xf32>
    %147 = arith.mulf %92, %2 : vector<8x1xf32>
    %148 = arith.addf %146, %147 : vector<8x1xf32>
    %149 = arith.mulf %104, %3 : vector<8x1xf32>
    %150 = arith.addf %148, %149 : vector<8x1xf32>
    %151 = arith.mulf %116, %1 : vector<8x1xf32>
    %152 = arith.mulf %128, %2 : vector<8x1xf32>
    %153 = arith.addf %151, %152 : vector<8x1xf32>
    %154 = arith.mulf %140, %3 : vector<8x1xf32>
    %155 = arith.addf %153, %154 : vector<8x1xf32>
    %c0_24 = arith.constant 0 : index
    %c0_25 = arith.constant 0 : index
    %156 = vector.load %arg2[%c0_24, %c0_25] : memref<8x6xf32, #tpu.memory_space<vmem>>, vector<8x6xf32>
    %157 = vector.extract_strided_slice %156 {offsets = [0, 0], sizes = [8, 1], strides = [1, 1]} : vector<8x6xf32> to vector<8x1xf32>
    %158 = vector.extract_strided_slice %156 {offsets = [0, 1], sizes = [8, 1], strides = [1, 1]} : vector<8x6xf32> to vector<8x1xf32>
    %159 = vector.extract_strided_slice %156 {offsets = [0, 2], sizes = [8, 1], strides = [1, 1]} : vector<8x6xf32> to vector<8x1xf32>
    %160 = vector.extract_strided_slice %156 {offsets = [0, 3], sizes = [8, 1], strides = [1, 1]} : vector<8x6xf32> to vector<8x1xf32>
    %161 = vector.extract_strided_slice %156 {offsets = [0, 4], sizes = [8, 1], strides = [1, 1]} : vector<8x6xf32> to vector<8x1xf32>
    %162 = vector.extract_strided_slice %156 {offsets = [0, 5], sizes = [8, 1], strides = [1, 1]} : vector<8x6xf32> to vector<8x1xf32>
    %163 = arith.mulf %160, %160 : vector<8x1xf32>
    %164 = arith.mulf %161, %161 : vector<8x1xf32>
    %165 = arith.addf %163, %164 : vector<8x1xf32>
    %166 = arith.mulf %162, %162 : vector<8x1xf32>
    %167 = arith.addf %165, %166 : vector<8x1xf32>
    %cst_26 = arith.constant 9.99999974E-5 : f32
    %168 = vector.broadcast %cst_26 : f32 to vector<8x1xf32>
    %169 = arith.maximumf %167, %168 : vector<8x1xf32>
    %170 = math.sqrt %169 : vector<8x1xf32>
    %171 = math.sin %170 : vector<8x1xf32>
    %172 = math.cos %170 : vector<8x1xf32>
    %173 = arith.divf %171, %170 : vector<8x1xf32>
    %cst_27 = arith.constant 1.000000e+00 : f32
    %174 = vector.broadcast %cst_27 : f32 to vector<8x1xf32>
    %175 = arith.subf %174, %172 : vector<8x1xf32>
    %176 = arith.mulf %170, %170 : vector<8x1xf32>
    %177 = arith.divf %175, %176 : vector<8x1xf32>
    %178 = arith.subf %170, %171 : vector<8x1xf32>
    %179 = arith.mulf %170, %170 : vector<8x1xf32>
    %180 = arith.mulf %179, %170 : vector<8x1xf32>
    %181 = arith.divf %178, %180 : vector<8x1xf32>
    %cst_28 = arith.constant 0.000000e+00 : f32
    %182 = vector.broadcast %cst_28 : f32 to vector<8x1xf32>
    %cst_29 = arith.constant 0.000000e+00 : f32
    %183 = vector.broadcast %cst_29 : f32 to vector<8x1xf32>
    %184 = arith.subf %183, %162 : vector<8x1xf32>
    %cst_30 = arith.constant 0.000000e+00 : f32
    %185 = vector.broadcast %cst_30 : f32 to vector<8x1xf32>
    %186 = arith.subf %185, %160 : vector<8x1xf32>
    %cst_31 = arith.constant 0.000000e+00 : f32
    %187 = vector.broadcast %cst_31 : f32 to vector<8x1xf32>
    %188 = arith.subf %187, %161 : vector<8x1xf32>
    %189 = arith.mulf %160, %160 : vector<8x1xf32>
    %190 = arith.subf %189, %167 : vector<8x1xf32>
    %191 = arith.mulf %173, %182 : vector<8x1xf32>
    %cst_32 = arith.constant 1.000000e+00 : f32
    %192 = vector.broadcast %cst_32 : f32 to vector<8x1xf32>
    %193 = arith.addf %192, %191 : vector<8x1xf32>
    %194 = arith.mulf %177, %190 : vector<8x1xf32>
    %195 = arith.addf %193, %194 : vector<8x1xf32>
    %196 = arith.mulf %177, %182 : vector<8x1xf32>
    %cst_33 = arith.constant 1.000000e+00 : f32
    %197 = vector.broadcast %cst_33 : f32 to vector<8x1xf32>
    %198 = arith.addf %197, %196 : vector<8x1xf32>
    %199 = arith.mulf %181, %190 : vector<8x1xf32>
    %200 = arith.addf %198, %199 : vector<8x1xf32>
    %201 = arith.mulf %160, %161 : vector<8x1xf32>
    %202 = arith.subf %201, %182 : vector<8x1xf32>
    %203 = arith.mulf %173, %184 : vector<8x1xf32>
    %cst_34 = arith.constant 0.000000e+00 : f32
    %204 = vector.broadcast %cst_34 : f32 to vector<8x1xf32>
    %205 = arith.addf %204, %203 : vector<8x1xf32>
    %206 = arith.mulf %177, %202 : vector<8x1xf32>
    %207 = arith.addf %205, %206 : vector<8x1xf32>
    %208 = arith.mulf %177, %184 : vector<8x1xf32>
    %cst_35 = arith.constant 0.000000e+00 : f32
    %209 = vector.broadcast %cst_35 : f32 to vector<8x1xf32>
    %210 = arith.addf %209, %208 : vector<8x1xf32>
    %211 = arith.mulf %181, %202 : vector<8x1xf32>
    %212 = arith.addf %210, %211 : vector<8x1xf32>
    %213 = arith.mulf %160, %162 : vector<8x1xf32>
    %214 = arith.subf %213, %182 : vector<8x1xf32>
    %215 = arith.mulf %173, %161 : vector<8x1xf32>
    %cst_36 = arith.constant 0.000000e+00 : f32
    %216 = vector.broadcast %cst_36 : f32 to vector<8x1xf32>
    %217 = arith.addf %216, %215 : vector<8x1xf32>
    %218 = arith.mulf %177, %214 : vector<8x1xf32>
    %219 = arith.addf %217, %218 : vector<8x1xf32>
    %220 = arith.mulf %177, %161 : vector<8x1xf32>
    %cst_37 = arith.constant 0.000000e+00 : f32
    %221 = vector.broadcast %cst_37 : f32 to vector<8x1xf32>
    %222 = arith.addf %221, %220 : vector<8x1xf32>
    %223 = arith.mulf %181, %214 : vector<8x1xf32>
    %224 = arith.addf %222, %223 : vector<8x1xf32>
    %225 = arith.mulf %161, %160 : vector<8x1xf32>
    %226 = arith.subf %225, %182 : vector<8x1xf32>
    %227 = arith.mulf %173, %162 : vector<8x1xf32>
    %cst_38 = arith.constant 0.000000e+00 : f32
    %228 = vector.broadcast %cst_38 : f32 to vector<8x1xf32>
    %229 = arith.addf %228, %227 : vector<8x1xf32>
    %230 = arith.mulf %177, %226 : vector<8x1xf32>
    %231 = arith.addf %229, %230 : vector<8x1xf32>
    %232 = arith.mulf %177, %162 : vector<8x1xf32>
    %cst_39 = arith.constant 0.000000e+00 : f32
    %233 = vector.broadcast %cst_39 : f32 to vector<8x1xf32>
    %234 = arith.addf %233, %232 : vector<8x1xf32>
    %235 = arith.mulf %181, %226 : vector<8x1xf32>
    %236 = arith.addf %234, %235 : vector<8x1xf32>
    %237 = arith.mulf %161, %161 : vector<8x1xf32>
    %238 = arith.subf %237, %167 : vector<8x1xf32>
    %239 = arith.mulf %173, %182 : vector<8x1xf32>
    %cst_40 = arith.constant 1.000000e+00 : f32
    %240 = vector.broadcast %cst_40 : f32 to vector<8x1xf32>
    %241 = arith.addf %240, %239 : vector<8x1xf32>
    %242 = arith.mulf %177, %238 : vector<8x1xf32>
    %243 = arith.addf %241, %242 : vector<8x1xf32>
    %244 = arith.mulf %177, %182 : vector<8x1xf32>
    %cst_41 = arith.constant 1.000000e+00 : f32
    %245 = vector.broadcast %cst_41 : f32 to vector<8x1xf32>
    %246 = arith.addf %245, %244 : vector<8x1xf32>
    %247 = arith.mulf %181, %238 : vector<8x1xf32>
    %248 = arith.addf %246, %247 : vector<8x1xf32>
    %249 = arith.mulf %161, %162 : vector<8x1xf32>
    %250 = arith.subf %249, %182 : vector<8x1xf32>
    %251 = arith.mulf %173, %186 : vector<8x1xf32>
    %cst_42 = arith.constant 0.000000e+00 : f32
    %252 = vector.broadcast %cst_42 : f32 to vector<8x1xf32>
    %253 = arith.addf %252, %251 : vector<8x1xf32>
    %254 = arith.mulf %177, %250 : vector<8x1xf32>
    %255 = arith.addf %253, %254 : vector<8x1xf32>
    %256 = arith.mulf %177, %186 : vector<8x1xf32>
    %cst_43 = arith.constant 0.000000e+00 : f32
    %257 = vector.broadcast %cst_43 : f32 to vector<8x1xf32>
    %258 = arith.addf %257, %256 : vector<8x1xf32>
    %259 = arith.mulf %181, %250 : vector<8x1xf32>
    %260 = arith.addf %258, %259 : vector<8x1xf32>
    %261 = arith.mulf %162, %160 : vector<8x1xf32>
    %262 = arith.subf %261, %182 : vector<8x1xf32>
    %263 = arith.mulf %173, %188 : vector<8x1xf32>
    %cst_44 = arith.constant 0.000000e+00 : f32
    %264 = vector.broadcast %cst_44 : f32 to vector<8x1xf32>
    %265 = arith.addf %264, %263 : vector<8x1xf32>
    %266 = arith.mulf %177, %262 : vector<8x1xf32>
    %267 = arith.addf %265, %266 : vector<8x1xf32>
    %268 = arith.mulf %177, %188 : vector<8x1xf32>
    %cst_45 = arith.constant 0.000000e+00 : f32
    %269 = vector.broadcast %cst_45 : f32 to vector<8x1xf32>
    %270 = arith.addf %269, %268 : vector<8x1xf32>
    %271 = arith.mulf %181, %262 : vector<8x1xf32>
    %272 = arith.addf %270, %271 : vector<8x1xf32>
    %273 = arith.mulf %162, %161 : vector<8x1xf32>
    %274 = arith.subf %273, %182 : vector<8x1xf32>
    %275 = arith.mulf %173, %160 : vector<8x1xf32>
    %cst_46 = arith.constant 0.000000e+00 : f32
    %276 = vector.broadcast %cst_46 : f32 to vector<8x1xf32>
    %277 = arith.addf %276, %275 : vector<8x1xf32>
    %278 = arith.mulf %177, %274 : vector<8x1xf32>
    %279 = arith.addf %277, %278 : vector<8x1xf32>
    %280 = arith.mulf %177, %160 : vector<8x1xf32>
    %cst_47 = arith.constant 0.000000e+00 : f32
    %281 = vector.broadcast %cst_47 : f32 to vector<8x1xf32>
    %282 = arith.addf %281, %280 : vector<8x1xf32>
    %283 = arith.mulf %181, %274 : vector<8x1xf32>
    %284 = arith.addf %282, %283 : vector<8x1xf32>
    %285 = arith.mulf %162, %162 : vector<8x1xf32>
    %286 = arith.subf %285, %167 : vector<8x1xf32>
    %287 = arith.mulf %173, %182 : vector<8x1xf32>
    %cst_48 = arith.constant 1.000000e+00 : f32
    %288 = vector.broadcast %cst_48 : f32 to vector<8x1xf32>
    %289 = arith.addf %288, %287 : vector<8x1xf32>
    %290 = arith.mulf %177, %286 : vector<8x1xf32>
    %291 = arith.addf %289, %290 : vector<8x1xf32>
    %292 = arith.mulf %177, %182 : vector<8x1xf32>
    %cst_49 = arith.constant 1.000000e+00 : f32
    %293 = vector.broadcast %cst_49 : f32 to vector<8x1xf32>
    %294 = arith.addf %293, %292 : vector<8x1xf32>
    %295 = arith.mulf %181, %286 : vector<8x1xf32>
    %296 = arith.addf %294, %295 : vector<8x1xf32>
    %297 = arith.mulf %200, %157 : vector<8x1xf32>
    %298 = arith.mulf %212, %158 : vector<8x1xf32>
    %299 = arith.addf %297, %298 : vector<8x1xf32>
    %300 = arith.mulf %224, %159 : vector<8x1xf32>
    %301 = arith.addf %299, %300 : vector<8x1xf32>
    %302 = arith.mulf %236, %157 : vector<8x1xf32>
    %303 = arith.mulf %248, %158 : vector<8x1xf32>
    %304 = arith.addf %302, %303 : vector<8x1xf32>
    %305 = arith.mulf %260, %159 : vector<8x1xf32>
    %306 = arith.addf %304, %305 : vector<8x1xf32>
    %307 = arith.mulf %272, %157 : vector<8x1xf32>
    %308 = arith.mulf %284, %158 : vector<8x1xf32>
    %309 = arith.addf %307, %308 : vector<8x1xf32>
    %310 = arith.mulf %296, %159 : vector<8x1xf32>
    %311 = arith.addf %309, %310 : vector<8x1xf32>
    %cst_50 = arith.constant 0.000000e+00 : f32
    %312 = vector.broadcast %cst_50 : f32 to vector<8x1xf32>
    %cst_51 = arith.constant 1.000000e+00 : f32
    %313 = vector.broadcast %cst_51 : f32 to vector<8x1xf32>
    %314 = tpu.concatenate %39, %51, %63, %312, %75, %87, %99, %312, %111, %123, %135, %312, %145, %150, %155, %313 in 1 : vector<8x1xf32>, vector<8x1xf32>, vector<8x1xf32>, vector<8x1xf32>, vector<8x1xf32>, vector<8x1xf32>, vector<8x1xf32>, vector<8x1xf32>, vector<8x1xf32>, vector<8x1xf32>, vector<8x1xf32>, vector<8x1xf32>, vector<8x1xf32>, vector<8x1xf32>, vector<8x1xf32>, vector<8x1xf32> -> vector<8x16xf32>
    %c0_52 = arith.constant 0 : index
    %c0_53 = arith.constant 0 : index
    %315 = vector.load %arg3[%c0_52, %c0_53] : memref<8x16xf32, #tpu.memory_space<vmem>>, vector<8x16xf32>
    tpu.vector_store %arg3[%c0_52, %c0_53], %314 {strides = array<i32>} : memref<8x16xf32, #tpu.memory_space<vmem>>, vector<8x16xf32>,
    %316 = arith.mulf %195, %39 : vector<8x1xf32>
    %317 = arith.mulf %231, %75 : vector<8x1xf32>
    %318 = arith.addf %316, %317 : vector<8x1xf32>
    %319 = arith.mulf %267, %111 : vector<8x1xf32>
    %320 = arith.addf %318, %319 : vector<8x1xf32>
    %321 = arith.mulf %195, %51 : vector<8x1xf32>
    %322 = arith.mulf %231, %87 : vector<8x1xf32>
    %323 = arith.addf %321, %322 : vector<8x1xf32>
    %324 = arith.mulf %267, %123 : vector<8x1xf32>
    %325 = arith.addf %323, %324 : vector<8x1xf32>
    %326 = arith.mulf %195, %63 : vector<8x1xf32>
    %327 = arith.mulf %231, %99 : vector<8x1xf32>
    %328 = arith.addf %326, %327 : vector<8x1xf32>
    %329 = arith.mulf %267, %135 : vector<8x1xf32>
    %330 = arith.addf %328, %329 : vector<8x1xf32>
    %331 = arith.mulf %207, %39 : vector<8x1xf32>
    %332 = arith.mulf %243, %75 : vector<8x1xf32>
    %333 = arith.addf %331, %332 : vector<8x1xf32>
    %334 = arith.mulf %279, %111 : vector<8x1xf32>
    %335 = arith.addf %333, %334 : vector<8x1xf32>
    %336 = arith.mulf %207, %51 : vector<8x1xf32>
    %337 = arith.mulf %243, %87 : vector<8x1xf32>
    %338 = arith.addf %336, %337 : vector<8x1xf32>
    %339 = arith.mulf %279, %123 : vector<8x1xf32>
    %340 = arith.addf %338, %339 : vector<8x1xf32>
    %341 = arith.mulf %207, %63 : vector<8x1xf32>
    %342 = arith.mulf %243, %99 : vector<8x1xf32>
    %343 = arith.addf %341, %342 : vector<8x1xf32>
    %344 = arith.mulf %279, %135 : vector<8x1xf32>
    %345 = arith.addf %343, %344 : vector<8x1xf32>
    %346 = arith.mulf %219, %39 : vector<8x1xf32>
    %347 = arith.mulf %255, %75 : vector<8x1xf32>
    %348 = arith.addf %346, %347 : vector<8x1xf32>
    %349 = arith.mulf %291, %111 : vector<8x1xf32>
    %350 = arith.addf %348, %349 : vector<8x1xf32>
    %351 = arith.mulf %219, %51 : vector<8x1xf32>
    %352 = arith.mulf %255, %87 : vector<8x1xf32>
    %353 = arith.addf %351, %352 : vector<8x1xf32>
    %354 = arith.mulf %291, %123 : vector<8x1xf32>
    %355 = arith.addf %353, %354 : vector<8x1xf32>
    %356 = arith.mulf %219, %63 : vector<8x1xf32>
    %357 = arith.mulf %255, %99 : vector<8x1xf32>
    %358 = arith.addf %356, %357 : vector<8x1xf32>
    %359 = arith.mulf %291, %135 : vector<8x1xf32>
    %360 = arith.addf %358, %359 : vector<8x1xf32>
    %361 = arith.mulf %301, %195 : vector<8x1xf32>
    %362 = arith.mulf %306, %207 : vector<8x1xf32>
    %363 = arith.addf %361, %362 : vector<8x1xf32>
    %364 = arith.mulf %311, %219 : vector<8x1xf32>
    %365 = arith.addf %363, %364 : vector<8x1xf32>
    %cst_54 = arith.constant 0.000000e+00 : f32
    %366 = vector.broadcast %cst_54 : f32 to vector<8x1xf32>
    %367 = arith.subf %366, %365 : vector<8x1xf32>
    %368 = arith.mulf %301, %231 : vector<8x1xf32>
    %369 = arith.mulf %306, %243 : vector<8x1xf32>
    %370 = arith.addf %368, %369 : vector<8x1xf32>
    %371 = arith.mulf %311, %255 : vector<8x1xf32>
    %372 = arith.addf %370, %371 : vector<8x1xf32>
    %cst_55 = arith.constant 0.000000e+00 : f32
    %373 = vector.broadcast %cst_55 : f32 to vector<8x1xf32>
    %374 = arith.subf %373, %372 : vector<8x1xf32>
    %375 = arith.mulf %301, %267 : vector<8x1xf32>
    %376 = arith.mulf %306, %279 : vector<8x1xf32>
    %377 = arith.addf %375, %376 : vector<8x1xf32>
    %378 = arith.mulf %311, %291 : vector<8x1xf32>
    %379 = arith.addf %377, %378 : vector<8x1xf32>
    %cst_56 = arith.constant 0.000000e+00 : f32
    %380 = vector.broadcast %cst_56 : f32 to vector<8x1xf32>
    %381 = arith.subf %380, %379 : vector<8x1xf32>
    %382 = arith.mulf %367, %39 : vector<8x1xf32>
    %383 = arith.mulf %374, %75 : vector<8x1xf32>
    %384 = arith.addf %382, %383 : vector<8x1xf32>
    %385 = arith.mulf %381, %111 : vector<8x1xf32>
    %386 = arith.addf %384, %385 : vector<8x1xf32>
    %387 = arith.addf %386, %145 : vector<8x1xf32>
    %388 = arith.mulf %367, %51 : vector<8x1xf32>
    %389 = arith.mulf %374, %87 : vector<8x1xf32>
    %390 = arith.addf %388, %389 : vector<8x1xf32>
    %391 = arith.mulf %381, %123 : vector<8x1xf32>
    %392 = arith.addf %390, %391 : vector<8x1xf32>
    %393 = arith.addf %392, %150 : vector<8x1xf32>
    %394 = arith.mulf %367, %63 : vector<8x1xf32>
    %395 = arith.mulf %374, %99 : vector<8x1xf32>
    %396 = arith.addf %394, %395 : vector<8x1xf32>
    %397 = arith.mulf %381, %135 : vector<8x1xf32>
    %398 = arith.addf %396, %397 : vector<8x1xf32>
    %399 = arith.addf %398, %155 : vector<8x1xf32>
    %400 = tpu.concatenate %320, %325, %330, %312, %335, %340, %345, %312, %350, %355, %360, %312, %387, %393, %399, %313 in 1 : vector<8x1xf32>, vector<8x1xf32>, vector<8x1xf32>, vector<8x1xf32>, vector<8x1xf32>, vector<8x1xf32>, vector<8x1xf32>, vector<8x1xf32>, vector<8x1xf32>, vector<8x1xf32>, vector<8x1xf32>, vector<8x1xf32>, vector<8x1xf32>, vector<8x1xf32>, vector<8x1xf32>, vector<8x1xf32> -> vector<8x16xf32>
    %c0_57 = arith.constant 0 : index
    %c0_58 = arith.constant 0 : index
    %401 = vector.load %arg4[%c0_57, %c0_58] : memref<8x16xf32, #tpu.memory_space<vmem>>, vector<8x16xf32>
    tpu.vector_store %arg4[%c0_57, %c0_58], %400 {strides = array<i32>} : memref<8x16xf32, #tpu.memory_space<vmem>>, vector<8x16xf32>,
    return
  }
  func.func @transform_0(%arg0: i32) -> (i32, i32) {
    %c0_i32 = arith.constant 0 : i32
    %c0_i32_0 = arith.constant 0 : i32
    return %arg0, %c0_i32 : i32, i32
  }
  func.func @transform_1(%arg0: i32) -> (i32, i32) {
    %c0_i32 = arith.constant 0 : i32
    %c0_i32_0 = arith.constant 0 : i32
    return %arg0, %c0_i32 : i32, i32
  }
  func.func @transform_2(%arg0: i32) -> (i32, i32) {
    %c0_i32 = arith.constant 0 : i32
    %c0_i32_0 = arith.constant 0 : i32
    return %arg0, %c0_i32 : i32, i32
  }
  func.func @transform_3(%arg0: i32) -> (i32, i32) {
    %c0_i32 = arith.constant 0 : i32
    %c0_i32_0 = arith.constant 0 : i32
    return %arg0, %c0_i32 : i32, i32
  }
}

</mosaic_0001>

<bundles_post_ra>
// kernel: tooth_assembler.3
= control target key start
LH: loop header
LB: loop body
LE: loop exit
PB: predicated region body
PF: predicated region fallthrough
CT: control target
= control target key end

     0   :  { %v121_v0 = vmov 1   ;;  %v122_v1 = vmov 0   ;;  %v123_v3 = vmov 5   ;;  %v124_v4 = vmov 4   ;;  %s169_s0 = inlined_call_operand.vmem [shape: f32[8,16], index: 0, kind: input, shape index: {}]   ;;  %s170_s1 = inlined_call_operand.vmem [shape: f32[3,8,128], index: 1, kind: input, shape index: {}]   ;;  %s171_s2 = inlined_call_operand.vmem [shape: f32[3,8,128], index: 2, kind: output, shape index: {}]  }
   0x1   :  { %111 = vset.pattern.permute.xlu1 %v121_v0  ;;  %109 = vset.pattern.permute.xlu0 %v122_v1  ;;  %v11_v2 = vld [vmem:[%s169_s0] sm:$0xff]  ;;  %v125_v5 = vmov 2   ;;  %v126_v6 = vmov 6   ;;  %v127_v7 = vmov 8   ;;  %v128_v8 = vmov 10   ;;  %v93_v20 = vld [vmem:[%s170_s1 + $0x8] sm:$0xff] }
   0x2   :  { %42 = vperm.xlu1 %111, %v11_v2   ;;  %19 = vperm.xlu0 %109, %v11_v2   ;;  %v129_v9 = vmov 9   ;;  %v130_v10 = vmov 14   ;;  %v131_v11 = vmov 12   ;;  %v132_v12 = vmov 13   ;;  %v12_v19 = vld [vmem:[%s170_s1] sm:$0xff]  ;;  %v94_v23 = vld [vmem:[%s170_s1 + $0x10] sm:$0xff] }
   0x6   :  { %112 = vset.pattern.permute.xlu1 %v123_v3  ;;  %110 = vset.pattern.permute.xlu0 %v124_v4 }
   0x7   :  { %47 = vperm.xlu1 %112, %v11_v2   ;;  %24 = vperm.xlu0 %110, %v11_v2  }
   0xb   :  { %113 = vset.pattern.permute.xlu1 %v125_v5  ;;  %114 = vset.pattern.permute.xlu0 %v126_v6 }
   0xc   :  { %66 = vperm.xlu1 %113, %v11_v2   ;;  %71 = vperm.xlu0 %114, %v11_v2  }
  0x10   :  { %115 = vset.pattern.permute.xlu1 %v127_v7  ;;  %117 = vset.pattern.permute.xlu0 %v128_v8 }
  0x11   :  { %30 = vperm.xlu1 %115, %v11_v2   ;;  %77 = vperm.xlu0 %117, %v11_v2  }
  0x15   :  { %116 = vset.pattern.permute.xlu1 %v129_v9  ;;  %120 = vset.pattern.permute.xlu0 %v130_v10 }
  0x16   :  { %53 = vperm.xlu1 %116, %v11_v2   ;;  %83 = vperm.xlu0 %120, %v11_v2  }
  0x1a   :  { %118 = vset.pattern.permute.xlu1 %v131_v11 }
  0x1b   :  { %36 = vperm.xlu1 %118, %v11_v2  }
  0x1f   :  { %119 = vset.pattern.permute.xlu1 %v132_v12 }
  0x20   :  { %59 = vperm.xlu1 %119, %v11_v2  }
  0x81   :  { %v43_v13 = vpop.permute.xlu1 %42  ;;  %v20_v14 = vpop.permute.xlu0 %19 }
  0x82   :  { %v22_v28 = vmul.f32 %v20_v14, %v12_v19  ;;  %v45_v38 = vmul.f32 %v43_v13, %v12_v19 }
  0x86   :  { %v48_v15 = vpop.permute.xlu1 %47  ;;  %v25_v16 = vpop.permute.xlu0 %24 }
  0x87   :  { %v27_v29 = vmul.f32 %v93_v20, %v25_v16  ;;  %v50_v36 = vmul.f32 %v93_v20, %v48_v15 }
  0x89   :  { %v28_v35 = vadd.f32 %v27_v29, %v22_v28  ;;  %v51_v42 = vadd.f32 %v50_v36, %v45_v38 }
  0x8b   :  { %v67_v17 = vpop.permute.xlu1 %66  ;;  %v72_v18 = vpop.permute.xlu0 %71 }
  0x8c   :  { %v69_v21 = vmul.f32 %v67_v17, %v12_v19  ;;  %v74_v22 = vmul.f32 %v93_v20, %v72_v18 }
  0x8e   :  { %v75_v26 = vadd.f32 %v74_v22, %v69_v21 }
  0x90   :  { %v31_v24 = vpop.permute.xlu1 %30  ;;  %v78_v25 = vpop.permute.xlu0 %77 }
  0x91   :  { %v80_v27 = vmul.f32 %v94_v23, %v78_v25  ;;  %v33_v31 = vmul.f32 %v94_v23, %v31_v24 }
  0x93   :  { %v81_v30 = vadd.f32 %v80_v27, %v75_v26  ;;  %v34_v37 = vadd.f32 %v33_v31, %v28_v35 }
  0x95   :  { %v54_v32 = vpop.permute.xlu1 %53  ;;  %v84_v33 = vpop.permute.xlu0 %83 }
  0x96   :  { %v86_v34 = vadd.f32 %v84_v33, %v81_v30  ;;  %v56_v39 = vmul.f32 %v94_v23, %v54_v32 }
  0x98   :  { %96 = vst [vmem:[%s171_s2 + $0x10] sm:$0xff] %v86_v34  ;;  %v57_v43 = vadd.f32 %v56_v39, %v51_v42 }
  0x9a   :  { %v37_v40 = vpop.permute.xlu1 %36 }
  0x9b   :  { %v39_v41 = vadd.f32 %v37_v40, %v34_v37 }
  0x9d   :  { %40 = vst [vmem:[%s171_s2] sm:$0xff] %v39_v41 }
  0x9f   :  { %v60_v44 = vpop.permute.xlu1 %59 }
  0xa0   :  { %v62_v45 = vadd.f32 %v60_v44, %v57_v43 }
  0xa2   :  { %95 = vst [vmem:[%s171_s2 + $0x8] sm:$0xff] %v62_v45 }

// kernel: tooth_assembler.2
= control target key start
LH: loop header
LB: loop body
LE: loop exit
PB: predicated region body
PF: predicated region fallthrough
CT: control target
= control target key end

     0   :  { %9 = vsyncpa [#allocation3], 0  ;;  %s1064_s12 = smov [#allocation2]   ;;  %s1595_s0 = inlined_call_operand.vmem [shape: f32[8,6], index: 0, kind: input, shape index: {}]   ;;  %s1596_s1 = inlined_call_operand.hbm [shape: f32[8,6], index: 1, kind: input, shape index: {}]   ;;  %s1597_s2 = inlined_call_operand.vmem [shape: f32[8,16], index: 2, kind: output, shape index: {0}]   ;;  %s1598_s3 = inlined_call_operand.vmem [shape: f32[8,16], index: 3, kind: output, shape index: {1}]  }
   0x1   :  { %s18_s13 = sshll.u32 %s1064_s12, 4  ;;  %s1040_s16 = scalar_lea.hbm %s1596_s1, 128  ;;  %s19_s13 = int_to_ptr.vmem [resolvable:$true] %s18_s13 }
   0x2   :  { %p1041_p0 = scmp.ne.s32.totalorder %s1596_s1, %s1040_s16  ;;  %p1044_p1 = scmp.lt.u32.totalorder %s1040_s16, %s1596_s1 }
   0x4   :  { %p1046_p2 = pnand %p1044_p1, %p1041_p0 }
   0x6   :  { %1049 = shalt.err (!%p1046_p2)
}
   0x7   :  { %s1050_s21 = scalar_lea.vmem %s19_s13, 128  ;;  %p1055_p4 = scmp.lt.s32.totalorder %s19_s13, %s19_s13 }
   0x8   :  { %p1051_p3 = scmp.ne.s32.totalorder %s19_s13, %s1050_s21  ;;  %p1056_p5 = scmp.lt.s32.totalorder %s1050_s21, %s1050_s21 }
   0xa   :  { %p1057_p6 = por %p1056_p5, %p1055_p4 }
   0xc   :  { %p1058_p7 = pnand %p1057_p6, %p1051_p3 }
   0xe   :  { %1061 = shalt.err (!%p1058_p7)
}
   0xf   :  { %21 = dma.hbm_to_vmem [thread:$0]  %s1596_s1, 128, %s19_s13, [#allocation3]  }
  0x10   :  { %1062 = dma.done.wait [#allocation3], 128  }
  0x11   :  { %1063 = vsyncadd [#allocation3], 4294967168  ;;  %v1118_v0 = vld [vmem:[%s1595_s0] sm:$0xff]  ;;  %s1065_s26 = smov 127   ;;  %s1066_s1 = smov 126  }
  0x12   :  { %v1120_v1 = vld [vmem:[#allocation2] sm:$0xff]  ;;  %v1128_v3 = vmul.f32 %v1118_v0, %v1118_v0  ;;  %s1067_s0 = smov 1   ;;  %s1068_s27 = smov 2   ;;  %v1192_v33 = vsub.f32 0.0, %v1118_v0  ;;  %v1070_v47 = vmov 683565275  }
  0x13   :  { %v1124_v2 = vmul.f32 %v1120_v1, %v1120_v1  ;;  %v1167_v16 = vsub.f32 0.0, %v1120_v1  ;;  %s1069_s28 = smov 3   ;;  %v1071_v49 = vmov 2475754826   ;;  %v1072_v51 = vmov 2131351028  }
  0x14   :  { %28 = vrot.lane.b32.xlu1 %v1128_v3, %s1065_s26  ;;  %v1073_v53 = vmov 2102212464   ;;  %v1074_v55 = vmov 920167782   ;;  %v1075_v62 = vmov 1326507024  }
  0x15   :  { %385 = vrot.lane.b32.xlu0 %v1124_v2, %s1065_s26  ;;  %s1076_s29 = smov 125   ;;  %s1077_s30 = smov 5  }
  0x16   :  { %s1078_s4 = smov 7   ;;  %s1079_s5 = smov 6  }
  0x17   :  { %s1080_s6 = smov 9   ;;  %s1081_s7 = smov 10  }
  0x18   :  { %32 = vrot.lane.b32.xlu1 %v1128_v3, %s1066_s1  ;;  %s1082_s8 = smov 11  }
  0x19   :  { %389 = vrot.lane.b32.xlu0 %v1124_v2, %s1066_s1 }
  0x1c   :  { %629 = vrot.lane.b32.xlu1 %v1120_v1, %s1065_s26 }
  0x86   :  { %v29_v5 = vpop.permute.xlu1 %28 }
  0x87   :  { %v386_v4 = vpop.permute.xlu0 %385  ;;  %v31_v6 = vadd.f32 %v29_v5, %v1128_v3 }
  0x88   :  { %v388_v7 = vadd.f32 %v386_v4, %v1124_v2 }
  0x8a   :  { %v33_v9 = vpop.permute.xlu1 %32 }
  0x8b   :  { %v390_v8 = vpop.permute.xlu0 %389  ;;  %v1144_v11 = vadd.f32 %v33_v9, %v31_v6 }
  0x8c   :  { %v1142_v10 = vadd.f32 %v390_v8, %v388_v7 }
  0x8d   :  { %v36_v13 = vmax.f32 %v1144_v11, 0.0001  ;;  %307 = vrot.lane.b32.xlu1 %v1144_v11, %s1067_s0 }
  0x8e   :  { %v393_v12 = vmax.f32 %v1142_v10, 0.0001  ;;  %664 = vrot.lane.b32.xlu0 %v1142_v10, %s1067_s0  ;;  %v1156_v14 = vpop.permute.xlu1 %629 }
  0x8f   :  { %v1164_v15 = vmul.f32 %v1156_v14, %v1120_v1  ;;  %vm39_vm2 = vcmp.eq.f32.partialorder %v36_v13, inf  ;;  %v42_v25 = vand.u32 2147483648, %v36_v13  ;;  %vm41_vm3 = vcmp.eq.f32.partialorder %v36_v13, 0.0 }
  0x90   :  { %1016 = vrsqrt.f32 %v393_v12  ;;  %vm396_vm0 = vcmp.eq.f32.partialorder %v393_v12, inf  ;;  %v399_v20 = vand.u32 2147483648, %v393_v12  ;;  %vm398_vm1 = vcmp.eq.f32.partialorder %v393_v12, 0.0 }
  0x91   :  { %1018 = vrsqrt.f32 %v36_v13  ;;  %346 = vrot.lane.b32.xlu1 %v1144_v11, %s1068_s27 }
  0x92   :  { %703 = vrot.lane.b32.xlu0 %v1142_v10, %s1068_s27 }
  0x95   :  { %645 = vrot.lane.b32.xlu1 %v1120_v1, %s1066_s1 }
  0x96   :  { %272 = vrot.lane.b32.xlu0 %v1118_v0, %s1065_s26 }
  0x99   :  { %679 = vrot.lane.b32.xlu1 %v1164_v15, %s1065_s26 }
  0x9a   :  { %v1017_v17 = vpop.eup %1016  ;;  %634 = vrot.lane.b32.xlu0 %v1167_v16, %s1066_s1 }
  0x9b   :  { %v1019_v18 = vpop.eup %1018  ;;  %v395_v19 = vmul.f32 %v1017_v17, %v393_v12 }
  0x9c   :  { %v38_v21 = vmul.f32 %v1019_v18, %v36_v13 }
  0x9d   :  { %v397_v22 = vsel %vm396_vm0, %v393_v12, %v395_v19  ;;  %288 = vrot.lane.b32.xlu1 %v1118_v0, %s1066_s1 }
  0x9e   :  { %v1173_v23 = vsel %vm398_vm1, %v399_v20, %v397_v22  ;;  %v40_v24 = vsel %vm39_vm2, %v36_v13, %v38_v21  ;;  %688 = vrot.lane.b32.xlu0 %v1167_v16, %s1065_s26 }
  0x9f   :  { %v401_v26 = vand.u32 2147483647, %v1173_v23  ;;  %v404_v27 = vand.u32 2139095040, %v1173_v23  ;;  %v1181_v28 = vsel %vm41_vm3, %v42_v25, %v40_v24  ;;  %vm403_vm2 = vcmp.lt.s32.totalorder %v1173_v23, 0 }
  0xa0   :  { %v44_v31 = vand.u32 2147483647, %v1181_v28  ;;  %v47_v32 = vand.u32 2139095040, %v1181_v28 }
  0xa1   :  { %v405_v29 = vshrl.u32 %v404_v27, 23  ;;  %v408_v30 = vand.u32 8388607, %v401_v26  ;;  %715 = vrot.lane.b32.xlu1 %v1120_v1, %s1069_s28  ;;  %vm402_vm3 = vcmp.le.f32.partialorder %v401_v26, 0.7853982 }
  0xa2   :  { %719 = vrot.lane.b32.xlu0 %v1120_v1, %s1068_s27  ;;  %v48_v35 = vshrl.u32 %v47_v32, 23  ;;  %v51_v39 = vand.u32 8388607, %v44_v31 }
  0xa3   :  { %v981_v34 = vadd.s32 4294967169, %v405_v29  ;;  %v409_v37 = vor.u32 8388608, %v408_v30 }
  0xa4   :  { %v973_v38 = vadd.s32 4294967169, %v48_v35  ;;  %v52_v45 = vor.u32 8388608, %v51_v39 }
  0xa5   :  { %v411_v36 = vadd.s32 1, %v981_v34  ;;  %277 = vrot.lane.b32.xlu1 %v1192_v33, %s1066_s1  ;;  %v1200_v44 = vshll.u32 %v409_v37, 8 }
  0xa6   :  { %724 = vrot.lane.b32.xlu0 %v1120_v1, %s1067_s0  ;;  %v54_v41 = vadd.s32 1, %v973_v38  ;;  %v92_v30 = vshll.u32 %v52_v45, 8 }
  0xa7   :  { %vm412_vm4 = vcmp.gt.s32.totalorder %v411_v36, 0 }
  0xa8   :  { %v413_v40 = vsel %vm412_vm4, %v411_v36, 0  ;;  %vm55_vm5 = vcmp.gt.s32.totalorder %v54_v41, 0  ;;  %vm46_vm4 = vcmp.lt.s32.totalorder %v1181_v28, 0 }
  0xa9   :  { %v414_v42 = vshrl.u32 %v413_v40, 5  ;;  %v415_v43 = vand.u32 31, %v413_v40  ;;  %v56_v7 = vsel %vm55_vm5, %v54_v41, 0  ;;  %vm45_vm5 = vcmp.le.f32.partialorder %v44_v31, 0.7853982 }
  0xaa   :  { %v58_v12 = vand.u32 31, %v56_v7  ;;  %v57_v35 = vshrl.u32 %v56_v7, 5 }
  0xab   :  { %v416_v46 = vsub.s32 32, %v415_v43  ;;  %v418_v48 = vshll.u32 %v1070_v47, %v415_v43  ;;  %v421_v50 = vshll.u32 %v1071_v49, %v415_v43  ;;  %v424_v52 = vshll.u32 %v1072_v51, %v415_v43 }
  0xac   :  { %v427_v54 = vshll.u32 %v1073_v53, %v415_v43  ;;  %v430_v56 = vshll.u32 %v1074_v55, %v415_v43  ;;  %vm433_vm6 = vcmp.lt.s32.totalorder %v414_v42, 1  ;;  %vm434_vm7 = vcmp.lt.s32.totalorder %v414_v42, 2 }
  0xad   :  { %v419_v57 = vshrl.u32 %v1071_v49, %v416_v46  ;;  %v422_v58 = vshrl.u32 %v1072_v51, %v416_v46  ;;  %v425_v59 = vshrl.u32 %v1073_v53, %v416_v46  ;;  %v417_v60 = vshrl.u32 %v1070_v47, %v416_v46 }
  0xae   :  { %v428_v61 = vshrl.u32 %v1074_v55, %v416_v46  ;;  %v431_v63 = vshrl.u32 %v1075_v62, %v416_v46  ;;  %vm435_vm8 = vcmp.lt.s32.totalorder %v414_v42, 3  ;;  %vm436_vm9 = vcmp.lt.s32.totalorder %v414_v42, 4 }
  0xaf   :  { %v420_v4 = vor.u32 %v419_v57, %v418_v48  ;;  %v423_v5 = vor.u32 %v422_v58, %v421_v50  ;;  %v426_v6 = vor.u32 %v425_v59, %v424_v52  ;;  %v59_v24 = vsub.s32 32, %v58_v12 }
  0xb0   :  { %v429_v8 = vor.u32 %v428_v61, %v427_v54  ;;  %v432_v9 = vor.u32 %v431_v63, %v430_v56  ;;  %v61_v36 = vshll.u32 %v1070_v47, %v58_v12  ;;  %v64_v46 = vshll.u32 %v1071_v49, %v58_v12 }
  0xb1   :  { %v437_v13 = vsel %vm433_vm6, %v417_v60, %v420_v4  ;;  %v438_v17 = vsel %vm436_vm9, %v426_v6, 2102212464  ;;  %v441_v18 = vsel %vm433_vm6, %v420_v4, %v423_v5  ;;  %v445_v19 = vsel %vm433_vm6, %v423_v5, %v426_v6 }
  0xb2   :  { %v439_v20 = vsel %vm435_vm8, %v423_v5, %v438_v17  ;;  %v442_v21 = vsel %vm436_vm9, %v429_v8, 920167782  ;;  %v446_v22 = vsel %vm436_vm9, %v432_v9, 1326507024  ;;  %v62_v43 = vshrl.u32 %v1071_v49, %v59_v24 }
  0xb3   :  { %v440_v25 = vsel %vm434_vm7, %v437_v13, %v439_v20  ;;  %v443_v27 = vsel %vm435_vm8, %v426_v6, %v442_v21  ;;  %v447_v29 = vsel %vm435_vm8, %v429_v8, %v446_v22  ;;  %v65_v45 = vshrl.u32 %v1072_v51, %v59_v24 }
  0xb4   :  { %v444_v32 = vsel %vm434_vm7, %v441_v18, %v443_v27  ;;  %v448_v34 = vsel %vm434_vm7, %v445_v19, %v447_v29  ;;  %v456_v41 = vmul.u32 %v1200_v44, %v440_v25  ;;  %v67_v48 = vshll.u32 %v1072_v51, %v58_v12 }
  0xb5   :  { %v1216_v37 = vmul.u32.u64.low %v1200_v44, %v448_v34  ;;  %v1217_v38 = vmul.u32.u64.high %v1200_v44, %v448_v34, %v1216_v37  ;;  %v1220_v39 = vmul.u32.u64.low %v1200_v44, %v444_v32  ;;  %v1221_v40 = vmul.u32.u64.high %v1200_v44, %v444_v32, %v1220_v39 }
  0xb6   :  { %v68_v50 = vshrl.u32 %v1073_v53, %v59_v24  ;;  %v70_v42 = vshll.u32 %v1073_v53, %v58_v12  ;;  %v71_v52 = vshrl.u32 %v1074_v55, %v59_v24  ;;  %v63_v54 = vor.u32 %v62_v43, %v61_v36 }
  0xb7   :  { %v66_v56 = vor.u32 %v65_v45, %v64_v46  ;;  %v73_v57 = vshll.u32 %v1074_v55, %v58_v12  ;;  %v74_v58 = vshrl.u32 %v1075_v62, %v59_v24  ;;  %v457_v59 = vadd.s32 %v1220_v39, %v1217_v38 }
  0xb8   :  { %vm458_vm10 = vc.u32 %v1217_v38, %v1220_v39  ;;  %v459_v60 = vadd.s32 1, %v1221_v40  ;;  %v69_v61 = vor.u32 %v68_v50, %v67_v48  ;;  %v60_v44 = vshrl.u32 %v1070_v47, %v59_v24 }
  0xb9   :  { %v72_v63 = vor.u32 %v71_v52, %v70_v42  ;;  %v75_v49 = vor.u32 %v74_v58, %v73_v57  ;;  %vm76_vm11 = vcmp.lt.s32.totalorder %v57_v35, 1  ;;  %vm78_vm12 = vcmp.lt.s32.totalorder %v57_v35, 3 }
  0xba   :  { %v460_v51 = vsel %vm458_vm10, %v459_v60, %v1221_v40  ;;  %vm79_vm13 = vcmp.lt.s32.totalorder %v57_v35, 4  ;;  %v84_v53 = vsel %vm76_vm11, %v63_v54, %v66_v56  ;;  %v88_v5 = vsel %vm76_vm11, %v66_v56, %v69_v61 }
  0xbb   :  { %v461_v4 = vadd.s32 %v460_v51, %v456_v41  ;;  %v81_v55 = vsel %vm79_vm13, %v69_v61, 2102212464  ;;  %v85_v62 = vsel %vm79_vm13, %v72_v63, 920167782  ;;  %vm77_vm14 = vcmp.lt.s32.totalorder %v57_v35, 2 }
  0xbc   :  { %v80_v6 = vsel %vm76_vm11, %v60_v44, %v63_v54  ;;  %v86_v7 = vsel %vm78_vm12, %v69_v61, %v85_v62  ;;  %v89_v8 = vsel %vm79_vm13, %v75_v49, 1326507024  ;;  %v82_v12 = vsel %vm78_vm12, %v66_v56, %v81_v55 }
  0xbd   :  { %v462_v9 = vadd.s32 536870912, %v461_v4  ;;  %v87_v13 = vsel %vm77_vm14, %v84_v53, %v86_v7  ;;  %v90_v47 = vsel %vm78_vm12, %v72_v63, %v89_v8  ;;  %v83_v24 = vsel %vm77_vm14, %v80_v6, %v82_v12 }
  0xbe   :  { %v91_v17 = vsel %vm77_vm14, %v88_v5, %v90_v47  ;;  %v1229_v18 = vmul.u32.u64.low %v92_v30, %v87_v13  ;;  %v1230_v19 = vmul.u32.u64.high %v92_v30, %v87_v13, %v1229_v18  ;;  %v99_v32 = vmul.u32 %v92_v30, %v83_v24 }
  0xbf   :  { %v463_v20 = vshrl.u32 %v462_v9, 30  ;;  %v1232_v21 = vmul.u32.u64.low %v92_v30, %v91_v17  ;;  %v1233_v22 = vmul.u32.u64.high %v92_v30, %v91_v17, %v1232_v21  ;;  %vm493_vm6 = vweird.f32 %v1173_v23 }
  0xc0   :  { %v102_v27 = vadd.s32 1, %v1230_v19  ;;  %vm136_vm13 = vweird.f32 %v1181_v28 }
  0xc1   :  { %v464_v25 = vshll.u32 %v463_v20, 30  ;;  %vm101_vm15 = vc.u32 %v1233_v22, %v1229_v18  ;;  %v487_v53 = vsub.s32 4, %v463_v20  ;;  %v100_v55 = vadd.s32 %v1229_v18, %v1233_v22 }
  0xc2   :  { %v103_v34 = vsel %vm101_vm15, %v102_v27, %v1230_v19  ;;  %v611_v18 = vmul.f32 %v1173_v23, %v1173_v23 }
  0xc3   :  { %v465_v29 = vsub.s32 %v461_v4, %v464_v25  ;;  %v104_v36 = vadd.s32 %v103_v34, %v99_v32  ;;  %v488_v12 = vsel %vm403_vm2, %v487_v53, %v463_v20 }
  0xc4   :  { %v490_v19 = vsel %vm402_vm3, 0, %v488_v12  ;;  %v615_v27 = vmul.f32 %v611_v18, %v1173_v23 }
  0xc5   :  { %v467_v35 = vsub.s32 0, %v465_v29  ;;  %v105_v38 = vadd.s32 536870912, %v104_v36  ;;  %v494_v25 = vadd.s32 3, %v490_v19  ;;  %v598_v20 = vand.u32 3, %v490_v19 }
  0xc7   :  { %v982_v37 = vmin.u32 %v467_v35, %v465_v29  ;;  %v106_v40 = vshrl.u32 %v105_v38, 30  ;;  %v495_v34 = vand.u32 3, %v494_v25  ;;  %vm603_vm7 = vcmp.eq.s32.totalorder %v598_v20, 2 }
  0xc8   :  { %vm600_vm9 = vcmp.eq.s32.totalorder %v598_v20, 0  ;;  %vm599_vm11 = vcmp.lt.s32.totalorder %v598_v20, 2 }
  0xc9   :  { %v469_v39 = vclz %v982_v37  ;;  %v107_v43 = vshll.u32 %v106_v40, 30  ;;  %v130_v26 = vsub.s32 4, %v106_v40  ;;  %vm500_vm8 = vcmp.eq.s32.totalorder %v495_v34, 2 }
  0xca   :  { %vm497_vm10 = vcmp.eq.s32.totalorder %v495_v34, 0  ;;  %vm496_vm12 = vcmp.lt.s32.totalorder %v495_v34, 2 }
  0xcb   :  { %v983_v41 = vadd.s32 4294967294, %v469_v39  ;;  %v108_v45 = vsub.s32 %v104_v36, %v107_v43  ;;  %v131_v36 = vsel %vm46_vm4, %v130_v26, %v106_v40  ;;  %v254_v43 = vmul.f32 %v1181_v28, %v1181_v28 }
  0xcd   :  { %vm984_vm0 = vcmp.lt.s32.totalorder %v983_v41, 0  ;;  %v110_v42 = vsub.s32 0, %v108_v45 }
  0xce   :  { %v472_v46 = vsel %vm984_vm0, 0, %v983_v41 }
  0xcf   :  { %v473_v48 = vsub.s32 32, %v472_v46  ;;  %v477_v50 = vsub.s32 4294967266, %v472_v46  ;;  %v474_v52 = vshll.u32 %v465_v29, %v472_v46  ;;  %v974_v56 = vmin.u32 %v110_v42, %v108_v45 }
  0xd1   :  { %v475_v30 = vshrl.u32 %v457_v59, %v473_v48  ;;  %v478_v54 = vadd.s32 127, %v477_v50  ;;  %v112_v60 = vclz %v974_v56 }
  0xd3   :  { %v476_v57 = vor.u32 %v475_v30, %v474_v52  ;;  %v479_v58 = vshll.u32 %v478_v54, 23  ;;  %v975_v44 = vadd.s32 4294967294, %v112_v60  ;;  %v258_v54 = vmul.f32 %v254_v43, %v1181_v28 }
  0xd5   :  { %v480_v61 = vor.u32 4788187, %v479_v58  ;;  %v483_v49 = vcvt.s32.f32 %v476_v57  ;;  %vm976_vm1 = vcmp.lt.s32.totalorder %v975_v44, 0 }
  0xd6   :  { %v115_v4 = vsel %vm976_vm1, 0, %v975_v44 }
  0xd7   :  { %v481_v63 = vand.u32 2147483647, %v480_v61  ;;  %v116_v62 = vsub.s32 32, %v115_v4  ;;  %v120_v5 = vsub.s32 4294967266, %v115_v4  ;;  %v117_v59 = vshll.u32 %v108_v45, %v115_v4 }
  0xd8   :  { %v133_v45 = vsel %vm45_vm5, 0, %v131_v36 }
  0xd9   :  { %v484_v51 = vmul.f32 %v483_v49, %v481_v63  ;;  %v118_v7 = vshrl.u32 %v100_v55, %v116_v62  ;;  %v121_v8 = vadd.s32 127, %v120_v5  ;;  %v137_v30 = vadd.s32 3, %v133_v45 }
  0xda   :  { %v241_v62 = vand.u32 3, %v133_v45 }
  0xdb   :  { %v485_v6 = vxor.u32 2147483648, %v484_v51  ;;  %v119_v47 = vor.u32 %v118_v7, %v117_v59  ;;  %v122_v17 = vshll.u32 %v121_v8, 23  ;;  %v138_v4 = vand.u32 3, %v137_v30 }
  0xdc   :  { %vm243_vm15 = vcmp.eq.s32.totalorder %v241_v62, 0  ;;  %vm246_vm1 = vcmp.eq.s32.totalorder %v241_v62, 2 }
  0xdd   :  { %v486_v9 = vsel %vm403_vm2, %v485_v6, %v484_v51  ;;  %v123_v21 = vor.u32 4788187, %v122_v17  ;;  %v126_v24 = vcvt.s32.f32 %v119_v47  ;;  %v619_v51 = vsub.f32 %v1124_v2, %v1142_v10 }
  0xde   :  { %v489_v13 = vsel %vm402_vm3, %v1173_v23, %v486_v9  ;;  %vm143_vm14 = vcmp.eq.s32.totalorder %v138_v4, 2  ;;  %vm140_vm0 = vcmp.eq.s32.totalorder %v138_v4, 0  ;;  %vm139_vm2 = vcmp.lt.s32.totalorder %v138_v4, 2 }
  0xdf   :  { %1020 = vcosq.f32 %v489_v13  ;;  %v124_v22 = vand.u32 2147483647, %v123_v21  ;;  %vm242_vm3 = vcmp.lt.s32.totalorder %v241_v62, 2 }
  0xe0   :  { %1022 = vsinq.f32 %v489_v13 }
  0xe1   :  { %v127_v29 = vmul.f32 %v126_v24, %v124_v22  ;;  %1024 = vrcp.f32 %v1173_v23 }
  0xe2   :  { %1026 = vrcp.f32 %v611_v18 }
  0xe3   :  { %v128_v32 = vxor.u32 2147483648, %v127_v29  ;;  %1028 = vrcp.f32 %v615_v27 }
  0xe5   :  { %v129_v35 = vsel %vm46_vm4, %v128_v32, %v127_v29  ;;  %v262_v32 = vsub.f32 %v1128_v3, %v1144_v11  ;;  %vm787_vm4 = vcmask 7168  }
  0xe6   :  { %v132_v38 = vsel %vm45_vm5, %v1181_v28, %v129_v35  ;;  %vm789_vm5 = vcmask 15360  }
  0xe7   :  { %1030 = vcosq.f32 %v132_v38 }
  0xe8   :  { %1032 = vsinq.f32 %v132_v38 }
  0xe9   :  { %v1021_v37 = vpop.eup %1020  ;;  %1034 = vrcp.f32 %v258_v54 }
  0xea   :  { %v1023_v39 = vpop.eup %1022  ;;  %v501_v41 = vxor.u32 2147483648, %v1021_v37  ;;  %1036 = vrcp.f32 %v1181_v28 }
  0xeb   :  { %v498_v46 = vxor.u32 2147483648, %v1023_v39  ;;  %v1025_v56 = vpop.eup %1024  ;;  %1038 = vrcp.f32 %v254_v43 }
  0xec   :  { %v605_v31 = vsel %vm603_vm7, %v501_v41, %v1023_v39  ;;  %v502_v40 = vsel %vm500_vm8, %v501_v41, %v1023_v39  ;;  %v1027_v60 = vpop.eup %1026  ;;  %vm795_vm7 = vcmask 39936   ;;  %vm793_vm8 = vcmask 31744  }
  0xed   :  { %v602_v48 = vsel %vm600_vm9, %v1021_v37, %v498_v46  ;;  %v499_v50 = vsel %vm497_vm10, %v1021_v37, %v498_v46  ;;  %v1029_v49 = vpop.eup %1028  ;;  %vm797_vm9 = vcmask 48128   ;;  %vm799_vm10 = vcmask 56320  }
  0xee   :  { %v606_v42 = vsel %vm599_vm11, %v602_v48, %v605_v31  ;;  %v503_v52 = vsel %vm496_vm12, %v499_v50, %v502_v40  ;;  %vm801_vm11 = vcmask 64512   ;;  %vm803_vm12 = vcmask 72704  }
  0xef   :  { %v607_v57 = vsel %vm493_vm6, nan, %v606_v42  ;;  %v504_v58 = vsel %vm493_vm6, nan, %v503_v52  ;;  %vm791_vm6 = vcmask 23552  }
  0xf0   :  { %v610_v61 = vsub.f32 1.0, %v607_v57  ;;  %v1259_v44 = vmul.f32 %v1025_v56, %v504_v58  ;;  %v614_v63 = vsub.f32 %v1173_v23, %v504_v58 }
  0xf1   :  { %v1031_v6 = vpop.eup %1030 }
  0xf2   :  { %v1264_v53 = vmul.f32 %v1027_v60, %v610_v61  ;;  %v1266_v55 = vmul.f32 %v1029_v49, %v614_v63  ;;  %v620_v5 = vmul.f32 0.0, %v1259_v44  ;;  %v1033_v7 = vpop.eup %1032  ;;  %v144_v23 = vxor.u32 2147483648, %v1031_v6 }
  0xf3   :  { %v141_v8 = vxor.u32 2147483648, %v1033_v7  ;;  %v1035_v29 = vpop.eup %1034  ;;  %v676_v52 = vmul.f32 %v1167_v16, %v1259_v44  ;;  %v697_v30 = vmul.f32 %v1259_v44, %v1120_v1 }
  0xf4   :  { %v622_v59 = vmul.f32 %v619_v51, %v1264_v53  ;;  %v624_v10 = vmul.f32 0.0, %v1264_v53  ;;  %v626_v9 = vmul.f32 %v619_v51, %v1266_v55  ;;  %v1274_v12 = vadd.f32 1.0, %v620_v5  ;;  %v1037_v34 = vpop.eup %1036 }
  0xf5   :  { %v145_v13 = vsel %vm143_vm14, %v144_v23, %v1033_v7  ;;  %v142_v17 = vsel %vm140_vm0, %v1031_v6, %v141_v8  ;;  %v245_v19 = vsel %vm243_vm15, %v1031_v6, %v141_v8  ;;  %v248_v21 = vsel %vm246_vm1, %v144_v23, %v1033_v7  ;;  %v1039_v31 = vpop.eup %1038 }
  0xf6   :  { %v1276_v47 = vadd.f32 1.0, %v624_v10  ;;  %v1279_v18 = vadd.f32 %v622_v59, %v1274_v12  ;;  %v146_v22 = vsel %vm139_vm2, %v142_v17, %v145_v13  ;;  %v249_v26 = vsel %vm242_vm3, %v245_v19, %v248_v21 }
  0xf7   :  { %v147_v25 = vsel %vm136_vm13, nan, %v146_v22  ;;  %v250_v35 = vsel %vm136_vm13, nan, %v249_v26  ;;  %v653_v48 = vmul.f32 %v1156_v14, %v1264_v53  ;;  %v639_v57 = vmul.f32 %v1164_v15, %v1264_v53 }
  0xf8   :  { %v1282_v24 = vadd.f32 %v626_v9, %v1276_v47  ;;  %v257_v27 = vsub.f32 %v1181_v28, %v147_v25  ;;  %v253_v41 = vsub.f32 1.0, %v250_v35  ;;  %v1298_v45 = vmul.f32 %v1037_v34, %v147_v25 }
  0xf9   :  { %v649_v28 = vmul.f32 %v1156_v14, %v1259_v44  ;;  %v643_v61 = vmul.f32 %v1164_v15, %v1266_v55  ;;  %v684_v63 = vmul.f32 %v1167_v16, %v1264_v53  ;;  %v700_v13 = vmul.f32 %v1264_v53, %v1120_v1 }
  0xfa   :  { %v1287_v20 = vmul.f32 %v1035_v29, %v257_v27  ;;  %v1301_v40 = vmul.f32 %v1039_v31, %v253_v41  ;;  %vm805_vm13 = vcmask 80896   ;;  %vm807_vm14 = vcmask 89088  }
  0xfb   :  { %vm809_vm15 = vcmask 97280   ;;  %vm811_vm0 = vcmask 105472   ;;  %vm813_vm1 = vcmask 113664   ;;  %vm815_vm2 = vcmask 121856  }
  0xfc   :  { %v1295_v39 = vmul.f32 %v262_v32, %v1287_v20  ;;  %v265_v49 = vmul.f32 %v262_v32, %v1301_v40  ;;  %vm817_vm3 = vcmask 130048  }
  0xff   :  { %v308_v37 = vpop.permute.xlu1 %307 }
 0x100   :  { %v665_v36 = vpop.permute.xlu0 %664  ;;  %v310_v54 = vsub.f32 %v1128_v3, %v308_v37 }
 0x101   :  { %v667_v38 = vsub.f32 %v1124_v2, %v665_v36 }
 0x103   :  { %669 = vrot.lane.b32.xlu0 %v667_v38, %s1065_s26  ;;  %v347_v46 = vpop.permute.xlu1 %346 }
 0x104   :  { %v704_v43 = vpop.permute.xlu0 %703  ;;  %v349_v9 = vsub.f32 %v1128_v3, %v347_v46 }
 0x105   :  { %v706_v11 = vsub.f32 %v1124_v2, %v704_v43  ;;  %v263_v2 = vmul.f32 0.0, %v1298_v45 }
 0x107   :  { %708 = vrot.lane.b32.xlu0 %v706_v11, %s1066_s1  ;;  %v646_v42 = vpop.permute.xlu1 %645  ;;  %v1331_v7 = vadd.f32 1.0, %v263_v2 }
 0x108   :  { %v273_v50 = vpop.permute.xlu0 %272  ;;  %v648_v58 = vmul.f32 %v646_v42, %v1120_v1  ;;  %v657_v14 = vmul.f32 %v646_v42, %v1259_v44  ;;  %v660_v60 = vmul.f32 %v646_v42, %v1264_v53 }
 0x109   :  { %v275_v56 = vmul.f32 %v273_v50, %v1118_v0  ;;  %v1357_v32 = vadd.f32 %v265_v49, %v1331_v7  ;;  %v292_v38 = vmul.f32 %v273_v50, %v1298_v45 }
 0x10a   :  { %v651_v51 = vmul.f32 %v648_v58, %v1264_v53  ;;  %v655_v4 = vmul.f32 %v648_v58, %v1266_v55  ;;  %v1329_v62 = vadd.f32 %v657_v14, %v639_v57  ;;  %v662_v59 = vadd.f32 %v660_v60, %v643_v61 }
 0x10b   :  { %322 = vrot.lane.b32.xlu1 %v275_v56, %s1065_s26  ;;  %312 = vrot.lane.b32.xlu0 %v310_v54, %s1065_s26  ;;  %v680_v6 = vpop.permute.xlu1 %679  ;;  %v1334_v15 = vmul.f32 %v275_v56, %v1287_v20  ;;  %v282_v41 = vmul.f32 %v275_v56, %v1301_v40  ;;  %v819_v2 = vmul.f32 %v1279_v18, %v1357_v32 }
 0x10c   :  { %v635_v5 = vpop.permute.xlu0 %634  ;;  %v1336_v16 = vadd.f32 %v651_v51, %v649_v28  ;;  %v682_v8 = vmul.f32 %v680_v6, %v1264_v53  ;;  %v686_v17 = vmul.f32 %v680_v6, %v1266_v55  ;;  %v656_v19 = vadd.f32 %v655_v4, %v653_v48 }
 0x10d   :  { %v637_v23 = vmul.f32 %v635_v5, %v1259_v44  ;;  %v641_v10 = vmul.f32 %v635_v5, %v1264_v53  ;;  %v296_v28 = vmul.f32 %v273_v50, %v1301_v40 }
 0x10e   :  { %v1347_v25 = vadd.f32 %v682_v8, %v676_v52  ;;  %v1349_v27 = vadd.f32 %v697_v30, %v682_v8  ;;  %v1353_v29 = vadd.f32 %v686_v17, %v684_v63  ;;  %v702_v26 = vadd.f32 %v700_v13, %v686_v17 }
 0x10f   :  { %v1345_v21 = vadd.f32 %v639_v57, %v637_v23  ;;  %v644_v22 = vadd.f32 %v643_v61, %v641_v10  ;;  %331 = vrot.lane.b32.xlu1 %v1192_v33, %s1065_s26  ;;  %351 = vrot.lane.b32.xlu0 %v349_v9, %s1066_s1  ;;  %v289_v1 = vpop.permute.xlu1 %288  ;;  %v849_v23 = vmul.f32 %v1336_v16, %v1357_v32 }
 0x110   :  { %v689_v3 = vpop.permute.xlu0 %688  ;;  %v291_v36 = vmul.f32 %v289_v1, %v1118_v0  ;;  %v300_v37 = vmul.f32 %v289_v1, %v1298_v45  ;;  %v303_v43 = vmul.f32 %v289_v1, %v1301_v40 }
 0x111   :  { %v691_v34 = vmul.f32 %v689_v3, %v1259_v44  ;;  %v694_v35 = vmul.f32 %v689_v3, %v1264_v53 }
 0x112   :  { %v1369_v31 = vmul.f32 %v291_v36, %v1301_v40  ;;  %v1372_v44 = vmul.f32 %v291_v36, %v1287_v20  ;;  %v1377_v48 = vadd.f32 %v300_v37, %v282_v41  ;;  %v1382_v30 = vadd.f32 %v303_v43, %v1334_v15 }
 0x113   :  { %v1366_v46 = vadd.f32 %v691_v34, %v651_v51  ;;  %v696_v11 = vadd.f32 %v694_v35, %v655_v4  ;;  %358 = vrot.lane.b32.xlu1 %v1118_v0, %s1069_s28  ;;  %362 = vrot.lane.b32.xlu0 %v1118_v0, %s1068_s27  ;;  %v716_v52 = vpop.permute.xlu1 %715 }
 0x114   :  { %v720_v42 = vpop.permute.xlu0 %719  ;;  %v1387_v54 = vadd.f32 %v1369_v31, %v292_v38  ;;  %v718_v50 = vmul.f32 %v716_v52, %v1282_v24  ;;  %v729_v58 = vmul.f32 %v716_v52, %v662_v59  ;;  %v1391_v60 = vadd.f32 %v1372_v44, %v296_v28 }
 0x115   :  { %v722_v56 = vmul.f32 %v720_v42, %v644_v22  ;;  %v735_v57 = vmul.f32 %v720_v42, %v702_v26  ;;  %v734_v14 = vmul.f32 %v716_v52, %v696_v11  ;;  %v820_v61 = vmul.f32 %v1329_v62, %v1377_v48 }
 0x116   :  { %v1399_v49 = vmul.f32 %v1279_v18, %v1387_v54  ;;  %v850_v51 = vmul.f32 %v1347_v25, %v1377_v48  ;;  %v1405_v24 = vmul.f32 %v1336_v16, %v1387_v54  ;;  %v1415_v10 = vmul.f32 %v1345_v21, %v1387_v54 }
 0x117   :  { %v723_v63 = vadd.f32 %v722_v56, %v718_v50  ;;  %367 = vrot.lane.b32.xlu1 %v1118_v0, %s1067_s0  ;;  %v736_v4 = vadd.f32 %v735_v57, %v734_v14  ;;  %740 = vrot.lane.b32.xlu0 %v1357_v32, %s1076_s29  ;;  %v278_v6 = vpop.permute.xlu1 %277  ;;  %v1409_v59 = vadd.f32 %v820_v61, %v819_v2 }
 0x118   :  { %v725_v5 = vpop.permute.xlu0 %724  ;;  %v280_v9 = vmul.f32 %v278_v6, %v1298_v45  ;;  %v1418_v13 = vadd.f32 %v850_v51, %v849_v23  ;;  %v834_v28 = vmul.f32 %v1345_v21, %v1357_v32  ;;  %v319_v14 = vmul.f32 %v1192_v33, %v1298_v45 }
 0x119   :  { %v727_v8 = vmul.f32 %v725_v5, %v656_v19  ;;  %v267_v19 = vmul.f32 0.0, %v1301_v40  ;;  %v732_v50 = vmul.f32 %v725_v5, %v1353_v29  ;;  %v340_v61 = vmul.f32 %v1298_v45, %v1118_v0 }
 0x11a   :  { %v1420_v22 = vadd.f32 %v282_v41, %v280_v9  ;;  %v284_v41 = vmul.f32 %v278_v6, %v1301_v40  ;;  %v327_v29 = vmul.f32 %v1192_v33, %v1301_v40  ;;  %v343_v23 = vmul.f32 %v1301_v40, %v1118_v0 }
 0x11b   :  { %v728_v17 = vadd.f32 %v727_v8, %v723_v63  ;;  %v268_v11 = vadd.f32 1.0, %v267_v19 }
 0x11c   :  { %744 = vrot.lane.b32.xlu1 %v1420_v22, %s1066_s1  ;;  %v824_v19 = vmul.f32 %v1279_v18, %v1420_v22  ;;  %v1470_v33 = vmul.f32 %v1345_v21, %v1420_v22 }
 0x11d   :  { %v870_v26 = vmul.f32 %v728_v17, %v1329_v62  ;;  %v1424_v3 = vmul.f32 %v728_v17, %v1366_v46  ;;  %v1429_v1 = vmul.f32 %v728_v17, %v1279_v18  ;;  %v270_v9 = vadd.f32 %v1295_v39, %v268_v11 }
 0x175   :  { %v670_v34 = vpop.permute.xlu0 %669 }
 0x176   :  { %v672_v35 = vmul.f32 %v670_v34, %v1264_v53  ;;  %v674_v36 = vmul.f32 %v670_v34, %v1266_v55 }
 0x178   :  { %v1435_v37 = vadd.f32 %v672_v35, %v1274_v12  ;;  %v675_v38 = vadd.f32 %v674_v36, %v1276_v47 }
 0x179   :  { %v709_v43 = vpop.permute.xlu0 %708 }
 0x17a   :  { %v730_v52 = vmul.f32 %v720_v42, %v675_v38  ;;  %v711_v2 = vmul.f32 %v709_v43, %v1264_v53  ;;  %v713_v56 = vmul.f32 %v709_v43, %v1266_v55  ;;  %v835_v57 = vmul.f32 %v1435_v37, %v1377_v48 }
 0x17b   :  { %v287_v55 = vadd.f32 %v1334_v15, %v284_v41 }
 0x17c   :  { %v731_v63 = vadd.f32 %v730_v52, %v729_v58  ;;  %v1451_v51 = vadd.f32 %v711_v2, %v1274_v12  ;;  %v714_v42 = vadd.f32 %v713_v56, %v1276_v47  ;;  %v1454_v53 = vadd.f32 %v835_v57, %v834_v28 }
 0x17d   :  { %v313_v6 = vpop.permute.xlu0 %312  ;;  %v323_v8 = vpop.permute.xlu1 %322 }
 0x17e   :  { %v733_v58 = vadd.f32 %v732_v50, %v731_v63  ;;  %v737_v17 = vmul.f32 %v725_v5, %v714_v42  ;;  %v315_v12 = vmul.f32 %v313_v6, %v1301_v40  ;;  %v317_v47 = vmul.f32 %v313_v6, %v1287_v20 }
 0x17f   :  { %v325_v34 = vmul.f32 %v323_v8, %v1301_v40  ;;  %v329_v15 = vmul.f32 %v323_v8, %v1287_v20 }
 0x180   :  { %v1473_v0 = vmul.f32 %v733_v58, %v1345_v21  ;;  %v871_v39 = vmul.f32 %v733_v58, %v1435_v37  ;;  %v1477_v5 = vmul.f32 %v733_v58, %v1349_v27  ;;  %v738_v35 = vadd.f32 %v737_v17, %v736_v4 }
 0x181   :  { %v1480_v36 = vadd.f32 %v315_v12, %v1331_v7  ;;  %v318_v38 = vadd.f32 %v317_v47, %v268_v11  ;;  %v1482_v41 = vadd.f32 %v325_v34, %v319_v14  ;;  %v330_v18 = vadd.f32 %v329_v15, %v327_v29  ;;  %v332_v43 = vpop.permute.xlu1 %331  ;;  %v352_v56 = vpop.permute.xlu0 %351 }
 0x182   :  { %v872_v28 = vadd.f32 %v871_v39, %v870_v26  ;;  %v1485_v52 = vmul.f32 %v738_v35, %v1336_v16  ;;  %v873_v21 = vmul.f32 %v738_v35, %v1347_v25  ;;  %v1489_v2 = vmul.f32 %v738_v35, %v1451_v51 }
 0x183   :  { %v1491_v57 = vadd.f32 %v340_v61, %v325_v34  ;;  %v345_v4 = vadd.f32 %v343_v23, %v329_v15  ;;  %v354_v50 = vmul.f32 %v352_v56, %v1301_v40  ;;  %v356_v14 = vmul.f32 %v352_v56, %v1287_v20 }
 0x184   :  { %v874_v63 = vadd.f32 %v873_v21, %v872_v28  ;;  %v334_v42 = vmul.f32 %v332_v43, %v1298_v45  ;;  %v337_v26 = vmul.f32 %v332_v43, %v1301_v40  ;;  %v830_v6 = vmul.f32 %v1329_v62, %v1482_v41 }
 0x185   :  { %v1500_v29 = vadd.f32 %v354_v50, %v1331_v7  ;;  %v357_v8 = vadd.f32 %v356_v14, %v268_v11  ;;  %v359_v58 = vpop.permute.xlu1 %358  ;;  %v860_v61 = vmul.f32 %v1347_v25, %v1482_v41  ;;  %v825_v23 = vmul.f32 %v1329_v62, %v1480_v36  ;;  %v363_v40 = vpop.permute.xlu0 %362 }
 0x186   :  { %v1507_v20 = vadd.f32 %v334_v42, %v1369_v31  ;;  %v339_v45 = vadd.f32 %v337_v26, %v1372_v44  ;;  %v361_v17 = vmul.f32 %v359_v58, %v270_v9  ;;  %v372_v12 = vmul.f32 %v359_v58, %v1382_v30 }
 0x187   :  { %v365_v47 = vmul.f32 %v363_v40, %v287_v55  ;;  %v373_v7 = vmul.f32 %v363_v40, %v318_v38  ;;  %v378_v34 = vmul.f32 %v363_v40, %v345_v4  ;;  %v831_v11 = vadd.f32 %v830_v6, %v1399_v49 }
 0x188   :  { %v377_v15 = vmul.f32 %v359_v58, %v339_v45  ;;  %v832_v39 = vmul.f32 %v1366_v46, %v1500_v29  ;;  %v822_v62 = vmul.f32 %v1366_v46, %v1507_v20  ;;  %v852_v31 = vmul.f32 %v1451_v51, %v1507_v20 }
 0x189   :  { %v366_v44 = vadd.f32 %v365_v47, %v361_v17  ;;  %v374_v35 = vadd.f32 %v373_v7, %v372_v12  ;;  %v368_v9 = vpop.permute.xlu1 %367  ;;  %v861_v30 = vadd.f32 %v860_v61, %v1405_v24  ;;  %v862_v55 = vmul.f32 %v1451_v51, %v1500_v29 }
 0x18a   :  { %v379_v38 = vadd.f32 %v378_v34, %v377_v15  ;;  %v370_v49 = vmul.f32 %v368_v9, %v1391_v60  ;;  %v375_v43 = vmul.f32 %v368_v9, %v330_v18  ;;  %v380_v28 = vmul.f32 %v368_v9, %v357_v8 }
 0x18b   :  { %v833_v21 = vadd.f32 %v832_v39, %v831_v11  ;;  %v823_v56 = vadd.f32 %v822_v62, %v1409_v59  ;;  %v853_v4 = vadd.f32 %v852_v31, %v1418_v13  ;;  %v863_v50 = vadd.f32 %v862_v55, %v861_v30 }
 0x18c   :  { %v826_v14 = vadd.f32 %v825_v23, %v824_v19  ;;  %v827_v42 = vmul.f32 %v1366_v46, %v1491_v57  ;;  %v837_v24 = vmul.f32 %v1349_v27, %v1507_v20  ;;  %v840_v26 = vmul.f32 %v1435_v37, %v1480_v36 }
 0x18d   :  { %909 = vrot.lane.b32.xlu1 %v833_v21, %s1065_s26  ;;  %901 = vrot.lane.b32.xlu0 %v823_v56, %s1076_s29  ;;  %v842_v60 = vmul.f32 %v1349_v27, %v1491_v57  ;;  %v845_v59 = vmul.f32 %v1435_v37, %v1482_v41  ;;  %v847_v13 = vmul.f32 %v1349_v27, %v1500_v29  ;;  %v875_v46 = vsub.f32 0.0, %v874_v63 }
 0x18e   :  { %v828_v19 = vadd.f32 %v827_v42, %v826_v14  ;;  %v838_v18 = vadd.f32 %v837_v24, %v1454_v53  ;;  %v841_v6 = vadd.f32 %v840_v26, %v1470_v33  ;;  %v371_v8 = vadd.f32 %v370_v49, %v366_v44 }
 0x18f   :  { %v846_v58 = vadd.f32 %v845_v59, %v1415_v10  ;;  %v854_v61 = vmul.f32 %v1336_v16, %v1420_v22  ;;  %v855_v23 = vmul.f32 %v1347_v25, %v1480_v36  ;;  %v866_v37 = vadd.f32 %v1473_v0, %v1429_v1 }
 0x190   :  { %v843_v45 = vadd.f32 %v842_v60, %v841_v6  ;;  %v857_v27 = vmul.f32 %v1451_v51, %v1491_v57  ;;  %v878_v53 = vadd.f32 %v1477_v5, %v1424_v3  ;;  %v883_v33 = vmul.f32 %v875_v46, %v1377_v48 }
 0x191   :  { %925 = vrot.lane.b32.xlu1 %v853_v4, %s1077_s30  ;;  %748 = vrot.lane.b32.xlu0 %v1387_v54, %s1065_s26  ;;  %v848_v16 = vadd.f32 %v847_v13, %v846_v58  ;;  %v856_v25 = vadd.f32 %v855_v23, %v854_v61  ;;  %v868_v10 = vadd.f32 %v1485_v52, %v866_v37 }
 0x192   :  { %v880_v1 = vadd.f32 %v1489_v2, %v878_v53  ;;  %v376_v0 = vadd.f32 %v375_v43, %v374_v35  ;;  %v381_v63 = vadd.f32 %v380_v28, %v379_v38  ;;  %v889_v3 = vmul.f32 %v875_v46, %v1480_v36 }
 0x193   :  { %v858_v51 = vadd.f32 %v857_v27, %v856_v25  ;;  %v869_v40 = vsub.f32 0.0, %v868_v10  ;;  %v895_v5 = vmul.f32 %v875_v46, %v1482_v41 }
 0x194   :  { %v881_v17 = vsub.f32 0.0, %v880_v1 }
 0x195   :  { %933 = vrot.lane.b32.xlu1 %v863_v50, %s1078_s4  ;;  %752 = vrot.lane.b32.xlu0 %v1377_v48, %s1067_s0  ;;  %v882_v12 = vmul.f32 %v869_v40, %v1357_v32  ;;  %v888_v52 = vmul.f32 %v869_v40, %v1420_v22  ;;  %v894_v2 = vmul.f32 %v869_v40, %v1387_v54 }
 0x196   :  { %v885_v47 = vmul.f32 %v881_v17, %v1507_v20  ;;  %v891_v7 = vmul.f32 %v881_v17, %v1491_v57  ;;  %v897_v39 = vmul.f32 %v881_v17, %v1500_v29 }
 0x197   :  { %v884_v34 = vadd.f32 %v883_v33, %v882_v12  ;;  %v890_v11 = vadd.f32 %v889_v3, %v888_v52  ;;  %v896_v15 = vadd.f32 %v895_v5, %v894_v2 }
 0x199   :  { %905 = vrot.lane.b32.xlu1 %v828_v19, %s1066_s1  ;;  %760 = vrot.lane.b32.xlu0 %v1482_v41, %s1069_s28  ;;  %v886_v48 = vadd.f32 %v885_v47, %v884_v34  ;;  %v892_v32 = vadd.f32 %v891_v7, %v890_v11  ;;  %v898_v62 = vadd.f32 %v897_v39, %v896_v15  ;;  %v741_v41 = vpop.permute.xlu0 %740 }
 0x19b   :  { %v887_v22 = vadd.f32 %v886_v48, %v371_v8  ;;  %v893_v31 = vadd.f32 %v892_v32, %v376_v0  ;;  %v899_v54 = vadd.f32 %v898_v62, %v381_v63 }
 0x19d   :  { %913 = vrot.lane.b32.xlu1 %v838_v18, %s1067_s0  ;;  %764 = vrot.lane.b32.xlu0 %v1507_v20, %s1077_s30 }
 0x1a1   :  { %917 = vrot.lane.b32.xlu1 %v843_v45, %s1068_s27  ;;  %768 = vrot.lane.b32.xlu0 %v1491_v57, %s1079_s5  ;;  %v745_v57 = vpop.permute.xlu1 %744 }
 0x1a2   :  { %v788_v50 = vsel %vm787_vm4, %v741_v41, %v745_v57 }
 0x1a5   :  { %921 = vrot.lane.b32.xlu1 %v848_v16, %s1069_s28  ;;  %776 = vrot.lane.b32.xlu0 %v371_v8, %s1080_s6 }
 0x1a9   :  { %929 = vrot.lane.b32.xlu1 %v858_v51, %s1079_s5  ;;  %756 = vrot.lane.b32.xlu0 %v1480_v36, %s1068_s27 }
 0x1ad   :  { %772 = vrot.lane.b32.xlu0 %v1500_v29, %s1078_s4  ;;  %937 = vrot.lane.b32.xlu1 %v887_v22, %s1080_s6 }
 0x1b1   :  { %780 = vrot.lane.b32.xlu0 %v376_v0, %s1081_s7  ;;  %941 = vrot.lane.b32.xlu1 %v893_v31, %s1081_s7 }
 0x1b5   :  { %784 = vrot.lane.b32.xlu0 %v381_v63, %s1082_s8  ;;  %945 = vrot.lane.b32.xlu1 %v899_v54, %s1082_s8 }
 0x1ff   :  { %v902_v20 = vpop.permute.xlu0 %901  ;;  %v910_v44 = vpop.permute.xlu1 %909 }
 0x203   :  { %v749_v35 = vpop.permute.xlu0 %748  ;;  %v926_v9 = vpop.permute.xlu1 %925 }
 0x204   :  { %v790_v42 = vsel %vm789_vm5, %v788_v50, %v749_v35 }
 0x205   :  { %v792_v46 = vsel %vm791_vm6, %v790_v42, 0.0 }
 0x207   :  { %v753_v30 = vpop.permute.xlu0 %752  ;;  %v934_v55 = vpop.permute.xlu1 %933 }
 0x208   :  { %v794_v18 = vsel %vm793_vm8, %v792_v46, %v753_v30 }
 0x20b   :  { %v761_v38 = vpop.permute.xlu0 %760  ;;  %v906_v36 = vpop.permute.xlu1 %905 }
 0x20c   :  { %v948_v49 = vsel %vm787_vm4, %v902_v20, %v906_v36 }
 0x20d   :  { %v949_v28 = vsel %vm789_vm5, %v948_v49, %v910_v44 }
 0x20e   :  { %v950_v21 = vsel %vm791_vm6, %v949_v28, 0.0 }
 0x20f   :  { %v765_v29 = vpop.permute.xlu0 %764  ;;  %v914_v43 = vpop.permute.xlu1 %913 }
 0x210   :  { %v951_v14 = vsel %vm793_vm8, %v950_v21, %v914_v43 }
 0x213   :  { %v769_v56 = vpop.permute.xlu0 %768  ;;  %v918_v4 = vpop.permute.xlu1 %917 }
 0x214   :  { %v952_v24 = vsel %vm795_vm7, %v951_v14, %v918_v4 }
 0x217   :  { %v777_v26 = vpop.permute.xlu0 %776  ;;  %v922_v60 = vpop.permute.xlu1 %921 }
 0x218   :  { %v953_v59 = vsel %vm797_vm9, %v952_v24, %v922_v60 }
 0x219   :  { %v954_v13 = vsel %vm799_vm10, %v953_v59, 0.0 }
 0x21a   :  { %v955_v19 = vsel %vm801_vm11, %v954_v13, %v926_v9 }
 0x21b   :  { %v757_v6 = vpop.permute.xlu0 %756  ;;  %v930_v8 = vpop.permute.xlu1 %929 }
 0x21c   :  { %v796_v58 = vsel %vm795_vm7, %v794_v18, %v757_v6  ;;  %v956_v23 = vsel %vm803_vm12, %v955_v19, %v930_v8 }
 0x21d   :  { %v798_v61 = vsel %vm797_vm9, %v796_v58, %v761_v38  ;;  %v957_v33 = vsel %vm805_vm13, %v956_v23, %v934_v55 }
 0x21e   :  { %v800_v37 = vsel %vm799_vm10, %v798_v61, 0.0  ;;  %v958_v1 = vsel %vm807_vm14, %v957_v33, 0.0 }
 0x21f   :  { %v773_v45 = vpop.permute.xlu0 %772  ;;  %v802_v27 = vsel %vm801_vm11, %v800_v37, %v765_v29  ;;  %v938_v53 = vpop.permute.xlu1 %937 }
 0x220   :  { %v804_v16 = vsel %vm803_vm12, %v802_v27, %v769_v56  ;;  %v959_v40 = vsel %vm809_vm15, %v958_v1, %v938_v53 }
 0x221   :  { %v806_v25 = vsel %vm805_vm13, %v804_v16, %v773_v45 }
 0x222   :  { %v808_v10 = vsel %vm807_vm14, %v806_v25, 0.0 }
 0x223   :  { %v781_v0 = vpop.permute.xlu0 %780  ;;  %v942_v63 = vpop.permute.xlu1 %941  ;;  %v810_v51 = vsel %vm809_vm15, %v808_v10, %v777_v26 }
 0x224   :  { %v812_v3 = vsel %vm811_vm0, %v810_v51, %v781_v0  ;;  %v960_v5 = vsel %vm811_vm0, %v959_v40, %v942_v63 }
 0x227   :  { %v785_v17 = vpop.permute.xlu0 %784  ;;  %v946_v12 = vpop.permute.xlu1 %945 }
 0x228   :  { %v814_v52 = vsel %vm813_vm1, %v812_v3, %v785_v17  ;;  %v961_v2 = vsel %vm813_vm1, %v960_v5, %v946_v12 }
 0x229   :  { %v816_v47 = vsel %vm815_vm2, %v814_v52, 1.0  ;;  %v962_v7 = vsel %vm815_vm2, %v961_v2, 1.0 }
 0x22a   :  { %818 = vst.msk [vmem:[%s1597_s2] sm:$0xff] %vm817_vm3, %v816_v47  ;;  %963 = vst.msk [vmem:[%s1598_s3] sm:$0xff] %vm817_vm3, %v962_v7 }
 0x22b   :  { %972 = vsyncpa [#allocation3], 1 }

</bundles_post_ra>
